<compile_context>
chip_gen: v6e
topology: v6e:2x2x1
jax: 0.10.0
libtpu: 0.0.40
codegen_flags: <defaults>
</compile_context>

<pallas_src>
import functools

import jax
import jax.numpy as jnp
from jax.experimental import pallas as pl
from jax.experimental.pallas import tpu as pltpu

CMP_DIM = 10
# Concatenation order used by UnaryPrimitivesPredefined.forward (primitive_list)
PRIMITIVES = ("acc", "pos_z", "speed_xy", "speed_z")


def _round_up(x: int, m: int) -> int:
    return (x + m - 1) // m * m


def _unary_primitives_kernel(xp_ref, thr_ref, out_ref, *, beta, state_dim, cmp_dim, length):
    """One M-tile of the fused feature + Inequality computation.

    xp_ref : [D, T+4, tm]  VMEM  time-padded states (2 reflected rows each end),
                                 row j <-> time t = j - 2; lanes = (batch*agents) tile.
    thr_ref: [4, C]        SMEM  thresholds (rows ordered as PRIMITIVES), scalar reads.
    out_ref: [4, C, T, tm] VMEM  lane-dense output tile (M on lanes -> unmasked stores).
    """
    T = length

    pos_z = xp_ref[2, pl.ds(2, T), :]                      # states[..., 2]     [T, tm]

    # AlignDifferential applied twice == pure central difference applied twice on the
    # padded sequence (padding rows built in the wrapper reproduce the reflected ends
    # exactly). Pure VPU math on ref-window loads; exact in f32, MXU not used.
    acc_sq = None   # sum_d acc_d^2
    sxy_sq = None   # vel_0^2 + vel_1^2
    sz = None       # sum_{d>=2} |vel_d|
    for d in range(state_dim):
        xm2 = xp_ref[d, pl.ds(0, T), :]
        xm1 = xp_ref[d, pl.ds(1, T), :]
        x00 = xp_ref[d, pl.ds(2, T), :]
        xp1 = xp_ref[d, pl.ds(3, T), :]
        xp2 = xp_ref[d, pl.ds(4, T), :]
        vel = (xp1 - xm1) * 0.5                            # AlignDifferential(states)
        acc = (xp2 - 2.0 * x00 + xm2) * 0.25               # AlignDifferential(velocity)
        acc_sq = acc * acc if acc_sq is None else acc_sq + acc * acc
        if d < 2:
            sxy_sq = vel * vel if sxy_sq is None else sxy_sq + vel * vel
        else:
            sz = jnp.abs(vel) if sz is None else sz + jnp.abs(vel)

    feats = (jnp.sqrt(acc_sq),   # 'acc'      : ||acc||_2 over state_dim
             pos_z,              # 'pos_z'
             jnp.sqrt(sxy_sq),   # 'speed_xy' : ||vel[..., :2]||_2
             sz)                 # 'speed_z'  : ||vel[..., 2:]||_1   (order == PRIMITIVES)

    # Inequality per (primitive, channel): scalar threshold from SMEM, lane-dense
    # [T, tm] compare/sigmoid, full-width unmasked store.
    for k, f in enumerate(feats):
        for c in range(cmp_dim):
            thr = thr_ref[k, c]
            val = f - thr
            if beta > 0:
                ev = jax.nn.sigmoid(val * beta)
            elif beta == 0:
                ev = (val > 0).astype(jnp.float32)
            else:
                ev = jax.nn.sigmoid(val * (1.0 / (-beta)))
            out_ref[k, c, :, :] = ev


def _pick_m_tile(D, T, C, M, *, budget_bytes=24 * 1024 * 1024, max_tile=512):
    """Largest lane tile (multiple of 128) whose double-buffered in+out blocks fit the
    VMEM budget (budget chosen to be safe for v7x's 64 MiB/core VMEM)."""
    per_lane = 2 * (D * (T + 4) + 4 * C * T) * 4           # bytes/lane column, x2 buffers
    tm = max(128, (budget_bytes // per_lane) // 128 * 128)
    return int(min(tm, max_tile, _round_up(M, 128)))


def unary_primitives_predefined(states, thresholds, *, beta=0.0, cmp_dim=CMP_DIM):
    """states: [batch, length, n_agents, state_dim] -> [batch, length, n_agents, 4*cmp_dim]."""
    B, T, N, D = states.shape
    assert D >= 3, "UnaryPrimitivesPredefined reads state component 2 (pos_z)"
    assert T >= 2, "AlignDifferential needs at least 2 time steps"
    C = int(cmp_dim)
    M = B * N

    tm = _pick_m_tile(D, T, C, M)
    M_pad = _round_up(M, tm)      # lane axis padded to a multiple of the (128-aligned) tile

    # glue: components leading, time on sublanes, (batch, agent) flattened on lanes
    x = jnp.transpose(states, (3, 1, 0, 2)).reshape(D, T, M).astype(jnp.float32)

    # Reflected-end time padding (2 rows each side), constructed so that the *pure*
    # central difference applied twice inside the kernel reproduces
    # AlignDifferential(AlignDifferential(states)) exactly, including boundary rows.
    x0, x1 = x[:, 0], x[:, 1]
    xl, xl1 = x[:, T - 1], x[:, T - 2]
    v_first = x1 - x0
    v_last = xl - xl1
    v_second = (x[:, 2] - x0) * 0.5 if T >= 3 else v_first
    v_penult = (xl - x[:, T - 3]) * 0.5 if T >= 3 else v_last
    pad_lo = jnp.stack([x0 - 2.0 * (2.0 * v_first - v_second),         # t = -2
                        2.0 * x0 - x1], axis=1)                        # t = -1
    pad_hi = jnp.stack([2.0 * xl - xl1,                                # t = T
                        xl + 2.0 * (2.0 * v_last - v_penult)], axis=1)  # t = T+1
    xp = jnp.concatenate([pad_lo, x, pad_hi], axis=1)                  # [D, T+4, M]
    if M_pad != M:
        xp = jnp.pad(xp, ((0, 0), (0, 0), (0, M_pad - M)))

    thr = thresholds.astype(jnp.float32)                               # [4, C] -> SMEM

    kernel = functools.partial(_unary_primitives_kernel, beta=float(beta),
                               state_dim=D, cmp_dim=C, length=T)
    out = pl.pallas_call(
        kernel,
        out_shape=jax.ShapeDtypeStruct((4, C, T, M_pad), jnp.float32),
        grid=(M_pad // tm,),
        in_specs=[
            pl.BlockSpec((D, T + 4, tm), lambda i: (0, 0, i)),          # VMEM, pipelined
            pl.BlockSpec(memory_space=pltpu.MemorySpace.SMEM),          # scalar thresholds
        ],
        out_specs=pl.BlockSpec((4, C, T, tm), lambda i: (0, 0, 0, i)),  # lane-dense tiles
        compiler_params=pltpu.CompilerParams(
            dimension_semantics=("parallel",),      # megacore: split M tiles across TCs
            vmem_limit_bytes=48 * 1024 * 1024,      # < 64 MiB physical VMEM on v7x
        ),
    )(xp, thr)

    # glue: [4, C, T, M_pad] -> [B, T, N, 4*C] (torch.cat ordering: out[..., k*C + c]).
    # This transpose re-touches the (dominant) output once in HBM; callers that can
    # consume the kernel-native lane-dense [4, C, T, M] layout should skip it.
    out = out[:, :, :, :M].reshape(4, C, T, B, N)
    out = jnp.transpose(out, (3, 2, 4, 0, 1)).reshape(B, T, N, 4 * C)
    return out


# ----------------------------- pure-JAX reference -----------------------------
def _align_differential_ref(x):
    padded = jnp.concatenate(
        [2 * x[:, :1] - x[:, 1:2], x, 2 * x[:, -1:] - x[:, -2:-1]], axis=1)
    return (padded[:, 2:] - padded[:, :-2]) / 2


def unary_primitives_ref(states, thresholds, beta=0.0):
    vel = _align_differential_ref(states)
    acc = _align_differential_ref(vel)
    inputs = {
        "acc": jnp.sqrt(jnp.sum(acc * acc, axis=3)),
        "pos_z": states[:, :, :, 2],
        "speed_xy": jnp.sqrt(jnp.sum(vel[:, :, :, :2] ** 2, axis=3)),
        "speed_z": jnp.sum(jnp.abs(vel[:, :, :, 2:]), axis=3),
    }
    outs = []
    for k, name in enumerate(PRIMITIVES):
        val = inputs[name][..., None] - thresholds[k]
        if beta > 0:
            outs.append(jax.nn.sigmoid(val * beta))
        elif beta == 0:
            outs.append((val > 0).astype(jnp.float32))
        else:
            outs.append(jax.nn.sigmoid(val / (-beta)))
    return jnp.concatenate(outs, axis=-1)


if __name__ == "__main__":
    key = jax.random.PRNGKey(0)
    B, T, N, D = 2, 8, 4, 3          # [batch, length, n_agents, state_dim]
    C = CMP_DIM

    k_states, k_u1, k_u2, k_n1, k_n2 = jax.random.split(key, 5)
    states = jax.random.normal(k_states, (B, T, N, D), dtype=jnp.float32)

    # Deterministic synthetic thresholds (Inequality.thresholds has shape [cmp_dim]);
    # 'normal' for acc/speed_xy, 'uniform' for pos_z/speed_z — matching the module.
    thr_acc = jax.random.normal(k_n1, (C,), dtype=jnp.float32)
    thr_pos_z = jax.random.uniform(k_u1, (C,), minval=-1.0, maxval=1.0, dtype=jnp.float32)
    thr_speed_xy = jax.random.normal(k_n2, (C,), dtype=jnp.float32)
    thr_speed_z = jax.random.uniform(k_u2, (C,), minval=-1.0, maxval=1.0, dtype=jnp.float32)
    thresholds = jnp.stack([thr_acc, thr_pos_z, thr_speed_xy, thr_speed_z], axis=0)  # [4, C]

    # default path (beta=0, hard thresholds): shape + binary-output check
    out_hard = jax.block_until_ready(
        unary_primitives_predefined(states, thresholds, beta=0.0))
    assert out_hard.shape == (B, T, N, 4 * C)
    assert bool(jnp.all((out_hard == 0.0) | (out_hard == 1.0)))

    # soft paths (beta > 0 and beta < 0), checked against the pure-JAX reference
    for beta in (2.0, -1.5):
        out_soft = jax.block_until_ready(
            unary_primitives_predefined(states, thresholds, beta=beta))
        ref_soft = unary_primitives_ref(states, thresholds, beta=beta)
        assert out_soft.shape == ref_soft.shape
        err = float(jnp.max(jnp.abs(out_soft - ref_soft)))
        assert err < 1e-4, err

    print("KERNEL_OK")
</pallas_src>

<mosaic_0001>
module attributes {stable_mosaic.version = 11 : i64} {
  func.func @_unary_primitives_kernel(%arg0: i32, %arg1: memref<3x12x128xf32, #tpu.memory_space<vmem>>, %arg2: memref<4x10xf32, #tpu.memory_space<smem>>, %arg3: memref<4x10x8x128xf32, #tpu.memory_space<vmem>>) attributes {dimension_semantics = [#tpu.dimension_semantics<parallel>], iteration_bounds = array<i64: 1>, scalar_prefetch = 0 : i64, scratch_operands = 0 : i64, tpu.core_type = #tpu.core_type<tc>, window_params = [{transform_indices = @transform_0, window_bounds = array<i64: 3, 12, 128>}, {transform_indices = @transform_1, window_bounds = array<i64: 4, 10>}, {transform_indices = @transform_2, window_bounds = array<i64: 4, 10, 8, 128>}]} {
    %c2 = arith.constant 2 : index
    %c2_0 = arith.constant 2 : index
    %c0 = arith.constant 0 : index
    %0 = vector.load %arg1[%c2, %c2_0, %c0] : memref<3x12x128xf32, #tpu.memory_space<vmem>>, vector<1x8x128xf32>
    %1 = vector.shape_cast %0 : vector<1x8x128xf32> to vector<8x128xf32>
    %c0_1 = arith.constant 0 : index
    %c0_2 = arith.constant 0 : index
    %c0_3 = arith.constant 0 : index
    %2 = vector.load %arg1[%c0_1, %c0_2, %c0_3] : memref<3x12x128xf32, #tpu.memory_space<vmem>>, vector<1x8x128xf32>
    %3 = vector.shape_cast %2 : vector<1x8x128xf32> to vector<8x128xf32>
    %c0_4 = arith.constant 0 : index
    %c1 = arith.constant 1 : index
    %c0_5 = arith.constant 0 : index
    %4 = vector.load %arg1[%c0_4, %c1, %c0_5] : memref<3x12x128xf32, #tpu.memory_space<vmem>>, vector<1x8x128xf32>
    %5 = vector.shape_cast %4 : vector<1x8x128xf32> to vector<8x128xf32>
    %c0_6 = arith.constant 0 : index
    %c2_7 = arith.constant 2 : index
    %c0_8 = arith.constant 0 : index
    %6 = vector.load %arg1[%c0_6, %c2_7, %c0_8] : memref<3x12x128xf32, #tpu.memory_space<vmem>>, vector<1x8x128xf32>
    %7 = vector.shape_cast %6 : vector<1x8x128xf32> to vector<8x128xf32>
    %c0_9 = arith.constant 0 : index
    %c3 = arith.constant 3 : index
    %c0_10 = arith.constant 0 : index
    %8 = vector.load %arg1[%c0_9, %c3, %c0_10] : memref<3x12x128xf32, #tpu.memory_space<vmem>>, vector<1x8x128xf32>
    %9 = vector.shape_cast %8 : vector<1x8x128xf32> to vector<8x128xf32>
    %c0_11 = arith.constant 0 : index
    %c4 = arith.constant 4 : index
    %c0_12 = arith.constant 0 : index
    %10 = vector.load %arg1[%c0_11, %c4, %c0_12] : memref<3x12x128xf32, #tpu.memory_space<vmem>>, vector<1x8x128xf32>
    %11 = vector.shape_cast %10 : vector<1x8x128xf32> to vector<8x128xf32>
    %12 = arith.subf %9, %5 : vector<8x128xf32>
    %cst = arith.constant 5.000000e-01 : f32
    %13 = vector.broadcast %cst : f32 to vector<8x128xf32>
    %14 = arith.mulf %12, %13 : vector<8x128xf32>
    %cst_13 = arith.constant 2.000000e+00 : f32
    %15 = vector.broadcast %cst_13 : f32 to vector<8x128xf32>
    %16 = arith.mulf %15, %7 : vector<8x128xf32>
    %17 = arith.subf %11, %16 : vector<8x128xf32>
    %18 = arith.addf %17, %3 : vector<8x128xf32>
    %cst_14 = arith.constant 2.500000e-01 : f32
    %19 = vector.broadcast %cst_14 : f32 to vector<8x128xf32>
    %20 = arith.mulf %18, %19 : vector<8x128xf32>
    %21 = arith.mulf %20, %20 : vector<8x128xf32>
    %22 = arith.mulf %14, %14 : vector<8x128xf32>
    %c1_15 = arith.constant 1 : index
    %c0_16 = arith.constant 0 : index
    %c0_17 = arith.constant 0 : index
    %23 = vector.load %arg1[%c1_15, %c0_16, %c0_17] : memref<3x12x128xf32, #tpu.memory_space<vmem>>, vector<1x8x128xf32>
    %24 = vector.shape_cast %23 : vector<1x8x128xf32> to vector<8x128xf32>
    %c1_18 = arith.constant 1 : index
    %c1_19 = arith.constant 1 : index
    %c0_20 = arith.constant 0 : index
    %25 = vector.load %arg1[%c1_18, %c1_19, %c0_20] : memref<3x12x128xf32, #tpu.memory_space<vmem>>, vector<1x8x128xf32>
    %26 = vector.shape_cast %25 : vector<1x8x128xf32> to vector<8x128xf32>
    %c1_21 = arith.constant 1 : index
    %c2_22 = arith.constant 2 : index
    %c0_23 = arith.constant 0 : index
    %27 = vector.load %arg1[%c1_21, %c2_22, %c0_23] : memref<3x12x128xf32, #tpu.memory_space<vmem>>, vector<1x8x128xf32>
    %28 = vector.shape_cast %27 : vector<1x8x128xf32> to vector<8x128xf32>
    %c1_24 = arith.constant 1 : index
    %c3_25 = arith.constant 3 : index
    %c0_26 = arith.constant 0 : index
    %29 = vector.load %arg1[%c1_24, %c3_25, %c0_26] : memref<3x12x128xf32, #tpu.memory_space<vmem>>, vector<1x8x128xf32>
    %30 = vector.shape_cast %29 : vector<1x8x128xf32> to vector<8x128xf32>
    %c1_27 = arith.constant 1 : index
    %c4_28 = arith.constant 4 : index
    %c0_29 = arith.constant 0 : index
    %31 = vector.load %arg1[%c1_27, %c4_28, %c0_29] : memref<3x12x128xf32, #tpu.memory_space<vmem>>, vector<1x8x128xf32>
    %32 = vector.shape_cast %31 : vector<1x8x128xf32> to vector<8x128xf32>
    %33 = arith.subf %30, %26 : vector<8x128xf32>
    %cst_30 = arith.constant 5.000000e-01 : f32
    %34 = vector.broadcast %cst_30 : f32 to vector<8x128xf32>
    %35 = arith.mulf %33, %34 : vector<8x128xf32>
    %cst_31 = arith.constant 2.000000e+00 : f32
    %36 = vector.broadcast %cst_31 : f32 to vector<8x128xf32>
    %37 = arith.mulf %36, %28 : vector<8x128xf32>
    %38 = arith.subf %32, %37 : vector<8x128xf32>
    %39 = arith.addf %38, %24 : vector<8x128xf32>
    %cst_32 = arith.constant 2.500000e-01 : f32
    %40 = vector.broadcast %cst_32 : f32 to vector<8x128xf32>
    %41 = arith.mulf %39, %40 : vector<8x128xf32>
    %42 = arith.mulf %41, %41 : vector<8x128xf32>
    %43 = arith.addf %21, %42 : vector<8x128xf32>
    %44 = arith.mulf %35, %35 : vector<8x128xf32>
    %45 = arith.addf %22, %44 : vector<8x128xf32>
    %c2_33 = arith.constant 2 : index
    %c0_34 = arith.constant 0 : index
    %c0_35 = arith.constant 0 : index
    %46 = vector.load %arg1[%c2_33, %c0_34, %c0_35] : memref<3x12x128xf32, #tpu.memory_space<vmem>>, vector<1x8x128xf32>
    %47 = vector.shape_cast %46 : vector<1x8x128xf32> to vector<8x128xf32>
    %c2_36 = arith.constant 2 : index
    %c1_37 = arith.constant 1 : index
    %c0_38 = arith.constant 0 : index
    %48 = vector.load %arg1[%c2_36, %c1_37, %c0_38] : memref<3x12x128xf32, #tpu.memory_space<vmem>>, vector<1x8x128xf32>
    %49 = vector.shape_cast %48 : vector<1x8x128xf32> to vector<8x128xf32>
    %c2_39 = arith.constant 2 : index
    %c2_40 = arith.constant 2 : index
    %c0_41 = arith.constant 0 : index
    %50 = vector.load %arg1[%c2_39, %c2_40, %c0_41] : memref<3x12x128xf32, #tpu.memory_space<vmem>>, vector<1x8x128xf32>
    %51 = vector.shape_cast %50 : vector<1x8x128xf32> to vector<8x128xf32>
    %c2_42 = arith.constant 2 : index
    %c3_43 = arith.constant 3 : index
    %c0_44 = arith.constant 0 : index
    %52 = vector.load %arg1[%c2_42, %c3_43, %c0_44] : memref<3x12x128xf32, #tpu.memory_space<vmem>>, vector<1x8x128xf32>
    %53 = vector.shape_cast %52 : vector<1x8x128xf32> to vector<8x128xf32>
    %c2_45 = arith.constant 2 : index
    %c4_46 = arith.constant 4 : index
    %c0_47 = arith.constant 0 : index
    %54 = vector.load %arg1[%c2_45, %c4_46, %c0_47] : memref<3x12x128xf32, #tpu.memory_space<vmem>>, vector<1x8x128xf32>
    %55 = vector.shape_cast %54 : vector<1x8x128xf32> to vector<8x128xf32>
    %56 = arith.subf %53, %49 : vector<8x128xf32>
    %cst_48 = arith.constant 5.000000e-01 : f32
    %57 = vector.broadcast %cst_48 : f32 to vector<8x128xf32>
    %58 = arith.mulf %56, %57 : vector<8x128xf32>
    %cst_49 = arith.constant 2.000000e+00 : f32
    %59 = vector.broadcast %cst_49 : f32 to vector<8x128xf32>
    %60 = arith.mulf %59, %51 : vector<8x128xf32>
    %61 = arith.subf %55, %60 : vector<8x128xf32>
    %62 = arith.addf %61, %47 : vector<8x128xf32>
    %cst_50 = arith.constant 2.500000e-01 : f32
    %63 = vector.broadcast %cst_50 : f32 to vector<8x128xf32>
    %64 = arith.mulf %62, %63 : vector<8x128xf32>
    %65 = arith.mulf %64, %64 : vector<8x128xf32>
    %66 = arith.addf %43, %65 : vector<8x128xf32>
    %67 = math.absf %58 : vector<8x128xf32>
    %68 = math.sqrt %66 : vector<8x128xf32>
    %69 = math.sqrt %45 : vector<8x128xf32>
    %c0_51 = arith.constant 0 : index
    %c0_52 = arith.constant 0 : index
    %70 = memref.load %arg2[%c0_51, %c0_52] : memref<4x10xf32, #tpu.memory_space<smem>>
    %71 = vector.broadcast %70 : f32 to vector<8x128xf32>
    %72 = arith.subf %68, %71 : vector<8x128xf32>
    %cst_53 = arith.constant 0.000000e+00 : f32
    %73 = vector.broadcast %cst_53 : f32 to vector<8x128xf32>
    %74 = arith.cmpf ogt, %72, %73 : vector<8x128xf32>
    %75 = arith.extui %74 : vector<8x128xi1> to vector<8x128xi32>
    %76 = arith.sitofp %75 : vector<8x128xi32> to vector<8x128xf32>
    %c0_54 = arith.constant 0 : index
    %c0_55 = arith.constant 0 : index
    %c0_56 = arith.constant 0 : index
    %c0_57 = arith.constant 0 : index
    %77 = vector.load %arg3[%c0_54, %c0_55, %c0_56, %c0_57] : memref<4x10x8x128xf32, #tpu.memory_space<vmem>>, vector<1x1x8x128xf32>
    %78 = vector.shape_cast %77 : vector<1x1x8x128xf32> to vector<8x128xf32>
    %79 = vector.shape_cast %76 : vector<8x128xf32> to vector<1x1x8x128xf32>
    tpu.vector_store %arg3[%c0_54, %c0_55, %c0_56, %c0_57], %79 {strides = array<i32>} : memref<4x10x8x128xf32, #tpu.memory_space<vmem>>, vector<1x1x8x128xf32>,
    %c0_58 = arith.constant 0 : index
    %c1_59 = arith.constant 1 : index
    %80 = memref.load %arg2[%c0_58, %c1_59] : memref<4x10xf32, #tpu.memory_space<smem>>
    %81 = vector.broadcast %80 : f32 to vector<8x128xf32>
    %82 = arith.subf %68, %81 : vector<8x128xf32>
    %cst_60 = arith.constant 0.000000e+00 : f32
    %83 = vector.broadcast %cst_60 : f32 to vector<8x128xf32>
    %84 = arith.cmpf ogt, %82, %83 : vector<8x128xf32>
    %85 = arith.extui %84 : vector<8x128xi1> to vector<8x128xi32>
    %86 = arith.sitofp %85 : vector<8x128xi32> to vector<8x128xf32>
    %c0_61 = arith.constant 0 : index
    %c1_62 = arith.constant 1 : index
    %c0_63 = arith.constant 0 : index
    %c0_64 = arith.constant 0 : index
    %87 = vector.load %arg3[%c0_61, %c1_62, %c0_63, %c0_64] : memref<4x10x8x128xf32, #tpu.memory_space<vmem>>, vector<1x1x8x128xf32>
    %88 = vector.shape_cast %87 : vector<1x1x8x128xf32> to vector<8x128xf32>
    %89 = vector.shape_cast %86 : vector<8x128xf32> to vector<1x1x8x128xf32>
    tpu.vector_store %arg3[%c0_61, %c1_62, %c0_63, %c0_64], %89 {strides = array<i32>} : memref<4x10x8x128xf32, #tpu.memory_space<vmem>>, vector<1x1x8x128xf32>,
    %c0_65 = arith.constant 0 : index
    %c2_66 = arith.constant 2 : index
    %90 = memref.load %arg2[%c0_65, %c2_66] : memref<4x10xf32, #tpu.memory_space<smem>>
    %91 = vector.broadcast %90 : f32 to vector<8x128xf32>
    %92 = arith.subf %68, %91 : vector<8x128xf32>
    %cst_67 = arith.constant 0.000000e+00 : f32
    %93 = vector.broadcast %cst_67 : f32 to vector<8x128xf32>
    %94 = arith.cmpf ogt, %92, %93 : vector<8x128xf32>
    %95 = arith.extui %94 : vector<8x128xi1> to vector<8x128xi32>
    %96 = arith.sitofp %95 : vector<8x128xi32> to vector<8x128xf32>
    %c0_68 = arith.constant 0 : index
    %c2_69 = arith.constant 2 : index
    %c0_70 = arith.constant 0 : index
    %c0_71 = arith.constant 0 : index
    %97 = vector.load %arg3[%c0_68, %c2_69, %c0_70, %c0_71] : memref<4x10x8x128xf32, #tpu.memory_space<vmem>>, vector<1x1x8x128xf32>
    %98 = vector.shape_cast %97 : vector<1x1x8x128xf32> to vector<8x128xf32>
    %99 = vector.shape_cast %96 : vector<8x128xf32> to vector<1x1x8x128xf32>
    tpu.vector_store %arg3[%c0_68, %c2_69, %c0_70, %c0_71], %99 {strides = array<i32>} : memref<4x10x8x128xf32, #tpu.memory_space<vmem>>, vector<1x1x8x128xf32>,
    %c0_72 = arith.constant 0 : index
    %c3_73 = arith.constant 3 : index
    %100 = memref.load %arg2[%c0_72, %c3_73] : memref<4x10xf32, #tpu.memory_space<smem>>
    %101 = vector.broadcast %100 : f32 to vector<8x128xf32>
    %102 = arith.subf %68, %101 : vector<8x128xf32>
    %cst_74 = arith.constant 0.000000e+00 : f32
    %103 = vector.broadcast %cst_74 : f32 to vector<8x128xf32>
    %104 = arith.cmpf ogt, %102, %103 : vector<8x128xf32>
    %105 = arith.extui %104 : vector<8x128xi1> to vector<8x128xi32>
    %106 = arith.sitofp %105 : vector<8x128xi32> to vector<8x128xf32>
    %c0_75 = arith.constant 0 : index
    %c3_76 = arith.constant 3 : index
    %c0_77 = arith.constant 0 : index
    %c0_78 = arith.constant 0 : index
    %107 = vector.load %arg3[%c0_75, %c3_76, %c0_77, %c0_78] : memref<4x10x8x128xf32, #tpu.memory_space<vmem>>, vector<1x1x8x128xf32>
    %108 = vector.shape_cast %107 : vector<1x1x8x128xf32> to vector<8x128xf32>
    %109 = vector.shape_cast %106 : vector<8x128xf32> to vector<1x1x8x128xf32>
    tpu.vector_store %arg3[%c0_75, %c3_76, %c0_77, %c0_78], %109 {strides = array<i32>} : memref<4x10x8x128xf32, #tpu.memory_space<vmem>>, vector<1x1x8x128xf32>,
    %c0_79 = arith.constant 0 : index
    %c4_80 = arith.constant 4 : index
    %110 = memref.load %arg2[%c0_79, %c4_80] : memref<4x10xf32, #tpu.memory_space<smem>>
    %111 = vector.broadcast %110 : f32 to vector<8x128xf32>
    %112 = arith.subf %68, %111 : vector<8x128xf32>
    %cst_81 = arith.constant 0.000000e+00 : f32
    %113 = vector.broadcast %cst_81 : f32 to vector<8x128xf32>
    %114 = arith.cmpf ogt, %112, %113 : vector<8x128xf32>
    %115 = arith.extui %114 : vector<8x128xi1> to vector<8x128xi32>
    %116 = arith.sitofp %115 : vector<8x128xi32> to vector<8x128xf32>
    %c0_82 = arith.constant 0 : index
    %c4_83 = arith.constant 4 : index
    %c0_84 = arith.constant 0 : index
    %c0_85 = arith.constant 0 : index
    %117 = vector.load %arg3[%c0_82, %c4_83, %c0_84, %c0_85] : memref<4x10x8x128xf32, #tpu.memory_space<vmem>>, vector<1x1x8x128xf32>
    %118 = vector.shape_cast %117 : vector<1x1x8x128xf32> to vector<8x128xf32>
    %119 = vector.shape_cast %116 : vector<8x128xf32> to vector<1x1x8x128xf32>
    tpu.vector_store %arg3[%c0_82, %c4_83, %c0_84, %c0_85], %119 {strides = array<i32>} : memref<4x10x8x128xf32, #tpu.memory_space<vmem>>, vector<1x1x8x128xf32>,
    %c0_86 = arith.constant 0 : index
    %c5 = arith.constant 5 : index
    %120 = memref.load %arg2[%c0_86, %c5] : memref<4x10xf32, #tpu.memory_space<smem>>
    %121 = vector.broadcast %120 : f32 to vector<8x128xf32>
    %122 = arith.subf %68, %121 : vector<8x128xf32>
    %cst_87 = arith.constant 0.000000e+00 : f32
    %123 = vector.broadcast %cst_87 : f32 to vector<8x128xf32>
    %124 = arith.cmpf ogt, %122, %123 : vector<8x128xf32>
    %125 = arith.extui %124 : vector<8x128xi1> to vector<8x128xi32>
    %126 = arith.sitofp %125 : vector<8x128xi32> to vector<8x128xf32>
    %c0_88 = arith.constant 0 : index
    %c5_89 = arith.constant 5 : index
    %c0_90 = arith.constant 0 : index
    %c0_91 = arith.constant 0 : index
    %127 = vector.load %arg3[%c0_88, %c5_89, %c0_90, %c0_91] : memref<4x10x8x128xf32, #tpu.memory_space<vmem>>, vector<1x1x8x128xf32>
    %128 = vector.shape_cast %127 : vector<1x1x8x128xf32> to vector<8x128xf32>
    %129 = vector.shape_cast %126 : vector<8x128xf32> to vector<1x1x8x128xf32>
    tpu.vector_store %arg3[%c0_88, %c5_89, %c0_90, %c0_91], %129 {strides = array<i32>} : memref<4x10x8x128xf32, #tpu.memory_space<vmem>>, vector<1x1x8x128xf32>,
    %c0_92 = arith.constant 0 : index
    %c6 = arith.constant 6 : index
    %130 = memref.load %arg2[%c0_92, %c6] : memref<4x10xf32, #tpu.memory_space<smem>>
    %131 = vector.broadcast %130 : f32 to vector<8x128xf32>
    %132 = arith.subf %68, %131 : vector<8x128xf32>
    %cst_93 = arith.constant 0.000000e+00 : f32
    %133 = vector.broadcast %cst_93 : f32 to vector<8x128xf32>
    %134 = arith.cmpf ogt, %132, %133 : vector<8x128xf32>
    %135 = arith.extui %134 : vector<8x128xi1> to vector<8x128xi32>
    %136 = arith.sitofp %135 : vector<8x128xi32> to vector<8x128xf32>
    %c0_94 = arith.constant 0 : index
    %c6_95 = arith.constant 6 : index
    %c0_96 = arith.constant 0 : index
    %c0_97 = arith.constant 0 : index
    %137 = vector.load %arg3[%c0_94, %c6_95, %c0_96, %c0_97] : memref<4x10x8x128xf32, #tpu.memory_space<vmem>>, vector<1x1x8x128xf32>
    %138 = vector.shape_cast %137 : vector<1x1x8x128xf32> to vector<8x128xf32>
    %139 = vector.shape_cast %136 : vector<8x128xf32> to vector<1x1x8x128xf32>
    tpu.vector_store %arg3[%c0_94, %c6_95, %c0_96, %c0_97], %139 {strides = array<i32>} : memref<4x10x8x128xf32, #tpu.memory_space<vmem>>, vector<1x1x8x128xf32>,
    %c0_98 = arith.constant 0 : index
    %c7 = arith.constant 7 : index
    %140 = memref.load %arg2[%c0_98, %c7] : memref<4x10xf32, #tpu.memory_space<smem>>
    %141 = vector.broadcast %140 : f32 to vector<8x128xf32>
    %142 = arith.subf %68, %141 : vector<8x128xf32>
    %cst_99 = arith.constant 0.000000e+00 : f32
    %143 = vector.broadcast %cst_99 : f32 to vector<8x128xf32>
    %144 = arith.cmpf ogt, %142, %143 : vector<8x128xf32>
    %145 = arith.extui %144 : vector<8x128xi1> to vector<8x128xi32>
    %146 = arith.sitofp %145 : vector<8x128xi32> to vector<8x128xf32>
    %c0_100 = arith.constant 0 : index
    %c7_101 = arith.constant 7 : index
    %c0_102 = arith.constant 0 : index
    %c0_103 = arith.constant 0 : index
    %147 = vector.load %arg3[%c0_100, %c7_101, %c0_102, %c0_103] : memref<4x10x8x128xf32, #tpu.memory_space<vmem>>, vector<1x1x8x128xf32>
    %148 = vector.shape_cast %147 : vector<1x1x8x128xf32> to vector<8x128xf32>
    %149 = vector.shape_cast %146 : vector<8x128xf32> to vector<1x1x8x128xf32>
    tpu.vector_store %arg3[%c0_100, %c7_101, %c0_102, %c0_103], %149 {strides = array<i32>} : memref<4x10x8x128xf32, #tpu.memory_space<vmem>>, vector<1x1x8x128xf32>,
    %c0_104 = arith.constant 0 : index
    %c8 = arith.constant 8 : index
    %150 = memref.load %arg2[%c0_104, %c8] : memref<4x10xf32, #tpu.memory_space<smem>>
    %151 = vector.broadcast %150 : f32 to vector<8x128xf32>
    %152 = arith.subf %68, %151 : vector<8x128xf32>
    %cst_105 = arith.constant 0.000000e+00 : f32
    %153 = vector.broadcast %cst_105 : f32 to vector<8x128xf32>
    %154 = arith.cmpf ogt, %152, %153 : vector<8x128xf32>
    %155 = arith.extui %154 : vector<8x128xi1> to vector<8x128xi32>
    %156 = arith.sitofp %155 : vector<8x128xi32> to vector<8x128xf32>
    %c0_106 = arith.constant 0 : index
    %c8_107 = arith.constant 8 : index
    %c0_108 = arith.constant 0 : index
    %c0_109 = arith.constant 0 : index
    %157 = vector.load %arg3[%c0_106, %c8_107, %c0_108, %c0_109] : memref<4x10x8x128xf32, #tpu.memory_space<vmem>>, vector<1x1x8x128xf32>
    %158 = vector.shape_cast %157 : vector<1x1x8x128xf32> to vector<8x128xf32>
    %159 = vector.shape_cast %156 : vector<8x128xf32> to vector<1x1x8x128xf32>
    tpu.vector_store %arg3[%c0_106, %c8_107, %c0_108, %c0_109], %159 {strides = array<i32>} : memref<4x10x8x128xf32, #tpu.memory_space<vmem>>, vector<1x1x8x128xf32>,
    %c0_110 = arith.constant 0 : index
    %c9 = arith.constant 9 : index
    %160 = memref.load %arg2[%c0_110, %c9] : memref<4x10xf32, #tpu.memory_space<smem>>
    %161 = vector.broadcast %160 : f32 to vector<8x128xf32>
    %162 = arith.subf %68, %161 : vector<8x128xf32>
    %cst_111 = arith.constant 0.000000e+00 : f32
    %163 = vector.broadcast %cst_111 : f32 to vector<8x128xf32>
    %164 = arith.cmpf ogt, %162, %163 : vector<8x128xf32>
    %165 = arith.extui %164 : vector<8x128xi1> to vector<8x128xi32>
    %166 = arith.sitofp %165 : vector<8x128xi32> to vector<8x128xf32>
    %c0_112 = arith.constant 0 : index
    %c9_113 = arith.constant 9 : index
    %c0_114 = arith.constant 0 : index
    %c0_115 = arith.constant 0 : index
    %167 = vector.load %arg3[%c0_112, %c9_113, %c0_114, %c0_115] : memref<4x10x8x128xf32, #tpu.memory_space<vmem>>, vector<1x1x8x128xf32>
    %168 = vector.shape_cast %167 : vector<1x1x8x128xf32> to vector<8x128xf32>
    %169 = vector.shape_cast %166 : vector<8x128xf32> to vector<1x1x8x128xf32>
    tpu.vector_store %arg3[%c0_112, %c9_113, %c0_114, %c0_115], %169 {strides = array<i32>} : memref<4x10x8x128xf32, #tpu.memory_space<vmem>>, vector<1x1x8x128xf32>,
    %c1_116 = arith.constant 1 : index
    %c0_117 = arith.constant 0 : index
    %170 = memref.load %arg2[%c1_116, %c0_117] : memref<4x10xf32, #tpu.memory_space<smem>>
    %171 = vector.broadcast %170 : f32 to vector<8x128xf32>
    %172 = arith.subf %1, %171 : vector<8x128xf32>
    %cst_118 = arith.constant 0.000000e+00 : f32
    %173 = vector.broadcast %cst_118 : f32 to vector<8x128xf32>
    %174 = arith.cmpf ogt, %172, %173 : vector<8x128xf32>
    %175 = arith.extui %174 : vector<8x128xi1> to vector<8x128xi32>
    %176 = arith.sitofp %175 : vector<8x128xi32> to vector<8x128xf32>
    %c1_119 = arith.constant 1 : index
    %c0_120 = arith.constant 0 : index
    %c0_121 = arith.constant 0 : index
    %c0_122 = arith.constant 0 : index
    %177 = vector.load %arg3[%c1_119, %c0_120, %c0_121, %c0_122] : memref<4x10x8x128xf32, #tpu.memory_space<vmem>>, vector<1x1x8x128xf32>
    %178 = vector.shape_cast %177 : vector<1x1x8x128xf32> to vector<8x128xf32>
    %179 = vector.shape_cast %176 : vector<8x128xf32> to vector<1x1x8x128xf32>
    tpu.vector_store %arg3[%c1_119, %c0_120, %c0_121, %c0_122], %179 {strides = array<i32>} : memref<4x10x8x128xf32, #tpu.memory_space<vmem>>, vector<1x1x8x128xf32>,
    %c1_123 = arith.constant 1 : index
    %c1_124 = arith.constant 1 : index
    %180 = memref.load %arg2[%c1_123, %c1_124] : memref<4x10xf32, #tpu.memory_space<smem>>
    %181 = vector.broadcast %180 : f32 to vector<8x128xf32>
    %182 = arith.subf %1, %181 : vector<8x128xf32>
    %cst_125 = arith.constant 0.000000e+00 : f32
    %183 = vector.broadcast %cst_125 : f32 to vector<8x128xf32>
    %184 = arith.cmpf ogt, %182, %183 : vector<8x128xf32>
    %185 = arith.extui %184 : vector<8x128xi1> to vector<8x128xi32>
    %186 = arith.sitofp %185 : vector<8x128xi32> to vector<8x128xf32>
    %c1_126 = arith.constant 1 : index
    %c1_127 = arith.constant 1 : index
    %c0_128 = arith.constant 0 : index
    %c0_129 = arith.constant 0 : index
    %187 = vector.load %arg3[%c1_126, %c1_127, %c0_128, %c0_129] : memref<4x10x8x128xf32, #tpu.memory_space<vmem>>, vector<1x1x8x128xf32>
    %188 = vector.shape_cast %187 : vector<1x1x8x128xf32> to vector<8x128xf32>
    %189 = vector.shape_cast %186 : vector<8x128xf32> to vector<1x1x8x128xf32>
    tpu.vector_store %arg3[%c1_126, %c1_127, %c0_128, %c0_129], %189 {strides = array<i32>} : memref<4x10x8x128xf32, #tpu.memory_space<vmem>>, vector<1x1x8x128xf32>,
    %c1_130 = arith.constant 1 : index
    %c2_131 = arith.constant 2 : index
    %190 = memref.load %arg2[%c1_130, %c2_131] : memref<4x10xf32, #tpu.memory_space<smem>>
    %191 = vector.broadcast %190 : f32 to vector<8x128xf32>
    %192 = arith.subf %1, %191 : vector<8x128xf32>
    %cst_132 = arith.constant 0.000000e+00 : f32
    %193 = vector.broadcast %cst_132 : f32 to vector<8x128xf32>
    %194 = arith.cmpf ogt, %192, %193 : vector<8x128xf32>
    %195 = arith.extui %194 : vector<8x128xi1> to vector<8x128xi32>
    %196 = arith.sitofp %195 : vector<8x128xi32> to vector<8x128xf32>
    %c1_133 = arith.constant 1 : index
    %c2_134 = arith.constant 2 : index
    %c0_135 = arith.constant 0 : index
    %c0_136 = arith.constant 0 : index
    %197 = vector.load %arg3[%c1_133, %c2_134, %c0_135, %c0_136] : memref<4x10x8x128xf32, #tpu.memory_space<vmem>>, vector<1x1x8x128xf32>
    %198 = vector.shape_cast %197 : vector<1x1x8x128xf32> to vector<8x128xf32>
    %199 = vector.shape_cast %196 : vector<8x128xf32> to vector<1x1x8x128xf32>
    tpu.vector_store %arg3[%c1_133, %c2_134, %c0_135, %c0_136], %199 {strides = array<i32>} : memref<4x10x8x128xf32, #tpu.memory_space<vmem>>, vector<1x1x8x128xf32>,
    %c1_137 = arith.constant 1 : index
    %c3_138 = arith.constant 3 : index
    %200 = memref.load %arg2[%c1_137, %c3_138] : memref<4x10xf32, #tpu.memory_space<smem>>
    %201 = vector.broadcast %200 : f32 to vector<8x128xf32>
    %202 = arith.subf %1, %201 : vector<8x128xf32>
    %cst_139 = arith.constant 0.000000e+00 : f32
    %203 = vector.broadcast %cst_139 : f32 to vector<8x128xf32>
    %204 = arith.cmpf ogt, %202, %203 : vector<8x128xf32>
    %205 = arith.extui %204 : vector<8x128xi1> to vector<8x128xi32>
    %206 = arith.sitofp %205 : vector<8x128xi32> to vector<8x128xf32>
    %c1_140 = arith.constant 1 : index
    %c3_141 = arith.constant 3 : index
    %c0_142 = arith.constant 0 : index
    %c0_143 = arith.constant 0 : index
    %207 = vector.load %arg3[%c1_140, %c3_141, %c0_142, %c0_143] : memref<4x10x8x128xf32, #tpu.memory_space<vmem>>, vector<1x1x8x128xf32>
    %208 = vector.shape_cast %207 : vector<1x1x8x128xf32> to vector<8x128xf32>
    %209 = vector.shape_cast %206 : vector<8x128xf32> to vector<1x1x8x128xf32>
    tpu.vector_store %arg3[%c1_140, %c3_141, %c0_142, %c0_143], %209 {strides = array<i32>} : memref<4x10x8x128xf32, #tpu.memory_space<vmem>>, vector<1x1x8x128xf32>,
    %c1_144 = arith.constant 1 : index
    %c4_145 = arith.constant 4 : index
    %210 = memref.load %arg2[%c1_144, %c4_145] : memref<4x10xf32, #tpu.memory_space<smem>>
    %211 = vector.broadcast %210 : f32 to vector<8x128xf32>
    %212 = arith.subf %1, %211 : vector<8x128xf32>
    %cst_146 = arith.constant 0.000000e+00 : f32
    %213 = vector.broadcast %cst_146 : f32 to vector<8x128xf32>
    %214 = arith.cmpf ogt, %212, %213 : vector<8x128xf32>
    %215 = arith.extui %214 : vector<8x128xi1> to vector<8x128xi32>
    %216 = arith.sitofp %215 : vector<8x128xi32> to vector<8x128xf32>
    %c1_147 = arith.constant 1 : index
    %c4_148 = arith.constant 4 : index
    %c0_149 = arith.constant 0 : index
    %c0_150 = arith.constant 0 : index
    %217 = vector.load %arg3[%c1_147, %c4_148, %c0_149, %c0_150] : memref<4x10x8x128xf32, #tpu.memory_space<vmem>>, vector<1x1x8x128xf32>
    %218 = vector.shape_cast %217 : vector<1x1x8x128xf32> to vector<8x128xf32>
    %219 = vector.shape_cast %216 : vector<8x128xf32> to vector<1x1x8x128xf32>
    tpu.vector_store %arg3[%c1_147, %c4_148, %c0_149, %c0_150], %219 {strides = array<i32>} : memref<4x10x8x128xf32, #tpu.memory_space<vmem>>, vector<1x1x8x128xf32>,
    %c1_151 = arith.constant 1 : index
    %c5_152 = arith.constant 5 : index
    %220 = memref.load %arg2[%c1_151, %c5_152] : memref<4x10xf32, #tpu.memory_space<smem>>
    %221 = vector.broadcast %220 : f32 to vector<8x128xf32>
    %222 = arith.subf %1, %221 : vector<8x128xf32>
    %cst_153 = arith.constant 0.000000e+00 : f32
    %223 = vector.broadcast %cst_153 : f32 to vector<8x128xf32>
    %224 = arith.cmpf ogt, %222, %223 : vector<8x128xf32>
    %225 = arith.extui %224 : vector<8x128xi1> to vector<8x128xi32>
    %226 = arith.sitofp %225 : vector<8x128xi32> to vector<8x128xf32>
    %c1_154 = arith.constant 1 : index
    %c5_155 = arith.constant 5 : index
    %c0_156 = arith.constant 0 : index
    %c0_157 = arith.constant 0 : index
    %227 = vector.load %arg3[%c1_154, %c5_155, %c0_156, %c0_157] : memref<4x10x8x128xf32, #tpu.memory_space<vmem>>, vector<1x1x8x128xf32>
    %228 = vector.shape_cast %227 : vector<1x1x8x128xf32> to vector<8x128xf32>
    %229 = vector.shape_cast %226 : vector<8x128xf32> to vector<1x1x8x128xf32>
    tpu.vector_store %arg3[%c1_154, %c5_155, %c0_156, %c0_157], %229 {strides = array<i32>} : memref<4x10x8x128xf32, #tpu.memory_space<vmem>>, vector<1x1x8x128xf32>,
    %c1_158 = arith.constant 1 : index
    %c6_159 = arith.constant 6 : index
    %230 = memref.load %arg2[%c1_158, %c6_159] : memref<4x10xf32, #tpu.memory_space<smem>>
    %231 = vector.broadcast %230 : f32 to vector<8x128xf32>
    %232 = arith.subf %1, %231 : vector<8x128xf32>
    %cst_160 = arith.constant 0.000000e+00 : f32
    %233 = vector.broadcast %cst_160 : f32 to vector<8x128xf32>
    %234 = arith.cmpf ogt, %232, %233 : vector<8x128xf32>
    %235 = arith.extui %234 : vector<8x128xi1> to vector<8x128xi32>
    %236 = arith.sitofp %235 : vector<8x128xi32> to vector<8x128xf32>
    %c1_161 = arith.constant 1 : index
    %c6_162 = arith.constant 6 : index
    %c0_163 = arith.constant 0 : index
    %c0_164 = arith.constant 0 : index
    %237 = vector.load %arg3[%c1_161, %c6_162, %c0_163, %c0_164] : memref<4x10x8x128xf32, #tpu.memory_space<vmem>>, vector<1x1x8x128xf32>
    %238 = vector.shape_cast %237 : vector<1x1x8x128xf32> to vector<8x128xf32>
    %239 = vector.shape_cast %236 : vector<8x128xf32> to vector<1x1x8x128xf32>
    tpu.vector_store %arg3[%c1_161, %c6_162, %c0_163, %c0_164], %239 {strides = array<i32>} : memref<4x10x8x128xf32, #tpu.memory_space<vmem>>, vector<1x1x8x128xf32>,
    %c1_165 = arith.constant 1 : index
    %c7_166 = arith.constant 7 : index
    %240 = memref.load %arg2[%c1_165, %c7_166] : memref<4x10xf32, #tpu.memory_space<smem>>
    %241 = vector.broadcast %240 : f32 to vector<8x128xf32>
    %242 = arith.subf %1, %241 : vector<8x128xf32>
    %cst_167 = arith.constant 0.000000e+00 : f32
    %243 = vector.broadcast %cst_167 : f32 to vector<8x128xf32>
    %244 = arith.cmpf ogt, %242, %243 : vector<8x128xf32>
    %245 = arith.extui %244 : vector<8x128xi1> to vector<8x128xi32>
    %246 = arith.sitofp %245 : vector<8x128xi32> to vector<8x128xf32>
    %c1_168 = arith.constant 1 : index
    %c7_169 = arith.constant 7 : index
    %c0_170 = arith.constant 0 : index
    %c0_171 = arith.constant 0 : index
    %247 = vector.load %arg3[%c1_168, %c7_169, %c0_170, %c0_171] : memref<4x10x8x128xf32, #tpu.memory_space<vmem>>, vector<1x1x8x128xf32>
    %248 = vector.shape_cast %247 : vector<1x1x8x128xf32> to vector<8x128xf32>
    %249 = vector.shape_cast %246 : vector<8x128xf32> to vector<1x1x8x128xf32>
    tpu.vector_store %arg3[%c1_168, %c7_169, %c0_170, %c0_171], %249 {strides = array<i32>} : memref<4x10x8x128xf32, #tpu.memory_space<vmem>>, vector<1x1x8x128xf32>,
    %c1_172 = arith.constant 1 : index
    %c8_173 = arith.constant 8 : index
    %250 = memref.load %arg2[%c1_172, %c8_173] : memref<4x10xf32, #tpu.memory_space<smem>>
    %251 = vector.broadcast %250 : f32 to vector<8x128xf32>
    %252 = arith.subf %1, %251 : vector<8x128xf32>
    %cst_174 = arith.constant 0.000000e+00 : f32
    %253 = vector.broadcast %cst_174 : f32 to vector<8x128xf32>
    %254 = arith.cmpf ogt, %252, %253 : vector<8x128xf32>
    %255 = arith.extui %254 : vector<8x128xi1> to vector<8x128xi32>
    %256 = arith.sitofp %255 : vector<8x128xi32> to vector<8x128xf32>
    %c1_175 = arith.constant 1 : index
    %c8_176 = arith.constant 8 : index
    %c0_177 = arith.constant 0 : index
    %c0_178 = arith.constant 0 : index
    %257 = vector.load %arg3[%c1_175, %c8_176, %c0_177, %c0_178] : memref<4x10x8x128xf32, #tpu.memory_space<vmem>>, vector<1x1x8x128xf32>
    %258 = vector.shape_cast %257 : vector<1x1x8x128xf32> to vector<8x128xf32>
    %259 = vector.shape_cast %256 : vector<8x128xf32> to vector<1x1x8x128xf32>
    tpu.vector_store %arg3[%c1_175, %c8_176, %c0_177, %c0_178], %259 {strides = array<i32>} : memref<4x10x8x128xf32, #tpu.memory_space<vmem>>, vector<1x1x8x128xf32>,
    %c1_179 = arith.constant 1 : index
    %c9_180 = arith.constant 9 : index
    %260 = memref.load %arg2[%c1_179, %c9_180] : memref<4x10xf32, #tpu.memory_space<smem>>
    %261 = vector.broadcast %260 : f32 to vector<8x128xf32>
    %262 = arith.subf %1, %261 : vector<8x128xf32>
    %cst_181 = arith.constant 0.000000e+00 : f32
    %263 = vector.broadcast %cst_181 : f32 to vector<8x128xf32>
    %264 = arith.cmpf ogt, %262, %263 : vector<8x128xf32>
    %265 = arith.extui %264 : vector<8x128xi1> to vector<8x128xi32>
    %266 = arith.sitofp %265 : vector<8x128xi32> to vector<8x128xf32>
    %c1_182 = arith.constant 1 : index
    %c9_183 = arith.constant 9 : index
    %c0_184 = arith.constant 0 : index
    %c0_185 = arith.constant 0 : index
    %267 = vector.load %arg3[%c1_182, %c9_183, %c0_184, %c0_185] : memref<4x10x8x128xf32, #tpu.memory_space<vmem>>, vector<1x1x8x128xf32>
    %268 = vector.shape_cast %267 : vector<1x1x8x128xf32> to vector<8x128xf32>
    %269 = vector.shape_cast %266 : vector<8x128xf32> to vector<1x1x8x128xf32>
    tpu.vector_store %arg3[%c1_182, %c9_183, %c0_184, %c0_185], %269 {strides = array<i32>} : memref<4x10x8x128xf32, #tpu.memory_space<vmem>>, vector<1x1x8x128xf32>,
    %c2_186 = arith.constant 2 : index
    %c0_187 = arith.constant 0 : index
    %270 = memref.load %arg2[%c2_186, %c0_187] : memref<4x10xf32, #tpu.memory_space<smem>>
    %271 = vector.broadcast %270 : f32 to vector<8x128xf32>
    %272 = arith.subf %69, %271 : vector<8x128xf32>
    %cst_188 = arith.constant 0.000000e+00 : f32
    %273 = vector.broadcast %cst_188 : f32 to vector<8x128xf32>
    %274 = arith.cmpf ogt, %272, %273 : vector<8x128xf32>
    %275 = arith.extui %274 : vector<8x128xi1> to vector<8x128xi32>
    %276 = arith.sitofp %275 : vector<8x128xi32> to vector<8x128xf32>
    %c2_189 = arith.constant 2 : index
    %c0_190 = arith.constant 0 : index
    %c0_191 = arith.constant 0 : index
    %c0_192 = arith.constant 0 : index
    %277 = vector.load %arg3[%c2_189, %c0_190, %c0_191, %c0_192] : memref<4x10x8x128xf32, #tpu.memory_space<vmem>>, vector<1x1x8x128xf32>
    %278 = vector.shape_cast %277 : vector<1x1x8x128xf32> to vector<8x128xf32>
    %279 = vector.shape_cast %276 : vector<8x128xf32> to vector<1x1x8x128xf32>
    tpu.vector_store %arg3[%c2_189, %c0_190, %c0_191, %c0_192], %279 {strides = array<i32>} : memref<4x10x8x128xf32, #tpu.memory_space<vmem>>, vector<1x1x8x128xf32>,
    %c2_193 = arith.constant 2 : index
    %c1_194 = arith.constant 1 : index
    %280 = memref.load %arg2[%c2_193, %c1_194] : memref<4x10xf32, #tpu.memory_space<smem>>
    %281 = vector.broadcast %280 : f32 to vector<8x128xf32>
    %282 = arith.subf %69, %281 : vector<8x128xf32>
    %cst_195 = arith.constant 0.000000e+00 : f32
    %283 = vector.broadcast %cst_195 : f32 to vector<8x128xf32>
    %284 = arith.cmpf ogt, %282, %283 : vector<8x128xf32>
    %285 = arith.extui %284 : vector<8x128xi1> to vector<8x128xi32>
    %286 = arith.sitofp %285 : vector<8x128xi32> to vector<8x128xf32>
    %c2_196 = arith.constant 2 : index
    %c1_197 = arith.constant 1 : index
    %c0_198 = arith.constant 0 : index
    %c0_199 = arith.constant 0 : index
    %287 = vector.load %arg3[%c2_196, %c1_197, %c0_198, %c0_199] : memref<4x10x8x128xf32, #tpu.memory_space<vmem>>, vector<1x1x8x128xf32>
    %288 = vector.shape_cast %287 : vector<1x1x8x128xf32> to vector<8x128xf32>
    %289 = vector.shape_cast %286 : vector<8x128xf32> to vector<1x1x8x128xf32>
    tpu.vector_store %arg3[%c2_196, %c1_197, %c0_198, %c0_199], %289 {strides = array<i32>} : memref<4x10x8x128xf32, #tpu.memory_space<vmem>>, vector<1x1x8x128xf32>,
    %c2_200 = arith.constant 2 : index
    %c2_201 = arith.constant 2 : index
    %290 = memref.load %arg2[%c2_200, %c2_201] : memref<4x10xf32, #tpu.memory_space<smem>>
    %291 = vector.broadcast %290 : f32 to vector<8x128xf32>
    %292 = arith.subf %69, %291 : vector<8x128xf32>
    %cst_202 = arith.constant 0.000000e+00 : f32
    %293 = vector.broadcast %cst_202 : f32 to vector<8x128xf32>
    %294 = arith.cmpf ogt, %292, %293 : vector<8x128xf32>
    %295 = arith.extui %294 : vector<8x128xi1> to vector<8x128xi32>
    %296 = arith.sitofp %295 : vector<8x128xi32> to vector<8x128xf32>
    %c2_203 = arith.constant 2 : index
    %c2_204 = arith.constant 2 : index
    %c0_205 = arith.constant 0 : index
    %c0_206 = arith.constant 0 : index
    %297 = vector.load %arg3[%c2_203, %c2_204, %c0_205, %c0_206] : memref<4x10x8x128xf32, #tpu.memory_space<vmem>>, vector<1x1x8x128xf32>
    %298 = vector.shape_cast %297 : vector<1x1x8x128xf32> to vector<8x128xf32>
    %299 = vector.shape_cast %296 : vector<8x128xf32> to vector<1x1x8x128xf32>
    tpu.vector_store %arg3[%c2_203, %c2_204, %c0_205, %c0_206], %299 {strides = array<i32>} : memref<4x10x8x128xf32, #tpu.memory_space<vmem>>, vector<1x1x8x128xf32>,
    %c2_207 = arith.constant 2 : index
    %c3_208 = arith.constant 3 : index
    %300 = memref.load %arg2[%c2_207, %c3_208] : memref<4x10xf32, #tpu.memory_space<smem>>
    %301 = vector.broadcast %300 : f32 to vector<8x128xf32>
    %302 = arith.subf %69, %301 : vector<8x128xf32>
    %cst_209 = arith.constant 0.000000e+00 : f32
    %303 = vector.broadcast %cst_209 : f32 to vector<8x128xf32>
    %304 = arith.cmpf ogt, %302, %303 : vector<8x128xf32>
    %305 = arith.extui %304 : vector<8x128xi1> to vector<8x128xi32>
    %306 = arith.sitofp %305 : vector<8x128xi32> to vector<8x128xf32>
    %c2_210 = arith.constant 2 : index
    %c3_211 = arith.constant 3 : index
    %c0_212 = arith.constant 0 : index
    %c0_213 = arith.constant 0 : index
    %307 = vector.load %arg3[%c2_210, %c3_211, %c0_212, %c0_213] : memref<4x10x8x128xf32, #tpu.memory_space<vmem>>, vector<1x1x8x128xf32>
    %308 = vector.shape_cast %307 : vector<1x1x8x128xf32> to vector<8x128xf32>
    %309 = vector.shape_cast %306 : vector<8x128xf32> to vector<1x1x8x128xf32>
    tpu.vector_store %arg3[%c2_210, %c3_211, %c0_212, %c0_213], %309 {strides = array<i32>} : memref<4x10x8x128xf32, #tpu.memory_space<vmem>>, vector<1x1x8x128xf32>,
    %c2_214 = arith.constant 2 : index
    %c4_215 = arith.constant 4 : index
    %310 = memref.load %arg2[%c2_214, %c4_215] : memref<4x10xf32, #tpu.memory_space<smem>>
    %311 = vector.broadcast %310 : f32 to vector<8x128xf32>
    %312 = arith.subf %69, %311 : vector<8x128xf32>
    %cst_216 = arith.constant 0.000000e+00 : f32
    %313 = vector.broadcast %cst_216 : f32 to vector<8x128xf32>
    %314 = arith.cmpf ogt, %312, %313 : vector<8x128xf32>
    %315 = arith.extui %314 : vector<8x128xi1> to vector<8x128xi32>
    %316 = arith.sitofp %315 : vector<8x128xi32> to vector<8x128xf32>
    %c2_217 = arith.constant 2 : index
    %c4_218 = arith.constant 4 : index
    %c0_219 = arith.constant 0 : index
    %c0_220 = arith.constant 0 : index
    %317 = vector.load %arg3[%c2_217, %c4_218, %c0_219, %c0_220] : memref<4x10x8x128xf32, #tpu.memory_space<vmem>>, vector<1x1x8x128xf32>
    %318 = vector.shape_cast %317 : vector<1x1x8x128xf32> to vector<8x128xf32>
    %319 = vector.shape_cast %316 : vector<8x128xf32> to vector<1x1x8x128xf32>
    tpu.vector_store %arg3[%c2_217, %c4_218, %c0_219, %c0_220], %319 {strides = array<i32>} : memref<4x10x8x128xf32, #tpu.memory_space<vmem>>, vector<1x1x8x128xf32>,
    %c2_221 = arith.constant 2 : index
    %c5_222 = arith.constant 5 : index
    %320 = memref.load %arg2[%c2_221, %c5_222] : memref<4x10xf32, #tpu.memory_space<smem>>
    %321 = vector.broadcast %320 : f32 to vector<8x128xf32>
    %322 = arith.subf %69, %321 : vector<8x128xf32>
    %cst_223 = arith.constant 0.000000e+00 : f32
    %323 = vector.broadcast %cst_223 : f32 to vector<8x128xf32>
    %324 = arith.cmpf ogt, %322, %323 : vector<8x128xf32>
    %325 = arith.extui %324 : vector<8x128xi1> to vector<8x128xi32>
    %326 = arith.sitofp %325 : vector<8x128xi32> to vector<8x128xf32>
    %c2_224 = arith.constant 2 : index
    %c5_225 = arith.constant 5 : index
    %c0_226 = arith.constant 0 : index
    %c0_227 = arith.constant 0 : index
    %327 = vector.load %arg3[%c2_224, %c5_225, %c0_226, %c0_227] : memref<4x10x8x128xf32, #tpu.memory_space<vmem>>, vector<1x1x8x128xf32>
    %328 = vector.shape_cast %327 : vector<1x1x8x128xf32> to vector<8x128xf32>
    %329 = vector.shape_cast %326 : vector<8x128xf32> to vector<1x1x8x128xf32>
    tpu.vector_store %arg3[%c2_224, %c5_225, %c0_226, %c0_227], %329 {strides = array<i32>} : memref<4x10x8x128xf32, #tpu.memory_space<vmem>>, vector<1x1x8x128xf32>,
    %c2_228 = arith.constant 2 : index
    %c6_229 = arith.constant 6 : index
    %330 = memref.load %arg2[%c2_228, %c6_229] : memref<4x10xf32, #tpu.memory_space<smem>>
    %331 = vector.broadcast %330 : f32 to vector<8x128xf32>
    %332 = arith.subf %69, %331 : vector<8x128xf32>
    %cst_230 = arith.constant 0.000000e+00 : f32
    %333 = vector.broadcast %cst_230 : f32 to vector<8x128xf32>
    %334 = arith.cmpf ogt, %332, %333 : vector<8x128xf32>
    %335 = arith.extui %334 : vector<8x128xi1> to vector<8x128xi32>
    %336 = arith.sitofp %335 : vector<8x128xi32> to vector<8x128xf32>
    %c2_231 = arith.constant 2 : index
    %c6_232 = arith.constant 6 : index
    %c0_233 = arith.constant 0 : index
    %c0_234 = arith.constant 0 : index
    %337 = vector.load %arg3[%c2_231, %c6_232, %c0_233, %c0_234] : memref<4x10x8x128xf32, #tpu.memory_space<vmem>>, vector<1x1x8x128xf32>
    %338 = vector.shape_cast %337 : vector<1x1x8x128xf32> to vector<8x128xf32>
    %339 = vector.shape_cast %336 : vector<8x128xf32> to vector<1x1x8x128xf32>
    tpu.vector_store %arg3[%c2_231, %c6_232, %c0_233, %c0_234], %339 {strides = array<i32>} : memref<4x10x8x128xf32, #tpu.memory_space<vmem>>, vector<1x1x8x128xf32>,
    %c2_235 = arith.constant 2 : index
    %c7_236 = arith.constant 7 : index
    %340 = memref.load %arg2[%c2_235, %c7_236] : memref<4x10xf32, #tpu.memory_space<smem>>
    %341 = vector.broadcast %340 : f32 to vector<8x128xf32>
    %342 = arith.subf %69, %341 : vector<8x128xf32>
    %cst_237 = arith.constant 0.000000e+00 : f32
    %343 = vector.broadcast %cst_237 : f32 to vector<8x128xf32>
    %344 = arith.cmpf ogt, %342, %343 : vector<8x128xf32>
    %345 = arith.extui %344 : vector<8x128xi1> to vector<8x128xi32>
    %346 = arith.sitofp %345 : vector<8x128xi32> to vector<8x128xf32>
    %c2_238 = arith.constant 2 : index
    %c7_239 = arith.constant 7 : index
    %c0_240 = arith.constant 0 : index
    %c0_241 = arith.constant 0 : index
    %347 = vector.load %arg3[%c2_238, %c7_239, %c0_240, %c0_241] : memref<4x10x8x128xf32, #tpu.memory_space<vmem>>, vector<1x1x8x128xf32>
    %348 = vector.shape_cast %347 : vector<1x1x8x128xf32> to vector<8x128xf32>
    %349 = vector.shape_cast %346 : vector<8x128xf32> to vector<1x1x8x128xf32>
    tpu.vector_store %arg3[%c2_238, %c7_239, %c0_240, %c0_241], %349 {strides = array<i32>} : memref<4x10x8x128xf32, #tpu.memory_space<vmem>>, vector<1x1x8x128xf32>,
    %c2_242 = arith.constant 2 : index
    %c8_243 = arith.constant 8 : index
    %350 = memref.load %arg2[%c2_242, %c8_243] : memref<4x10xf32, #tpu.memory_space<smem>>
    %351 = vector.broadcast %350 : f32 to vector<8x128xf32>
    %352 = arith.subf %69, %351 : vector<8x128xf32>
    %cst_244 = arith.constant 0.000000e+00 : f32
    %353 = vector.broadcast %cst_244 : f32 to vector<8x128xf32>
    %354 = arith.cmpf ogt, %352, %353 : vector<8x128xf32>
    %355 = arith.extui %354 : vector<8x128xi1> to vector<8x128xi32>
    %356 = arith.sitofp %355 : vector<8x128xi32> to vector<8x128xf32>
    %c2_245 = arith.constant 2 : index
    %c8_246 = arith.constant 8 : index
    %c0_247 = arith.constant 0 : index
    %c0_248 = arith.constant 0 : index
    %357 = vector.load %arg3[%c2_245, %c8_246, %c0_247, %c0_248] : memref<4x10x8x128xf32, #tpu.memory_space<vmem>>, vector<1x1x8x128xf32>
    %358 = vector.shape_cast %357 : vector<1x1x8x128xf32> to vector<8x128xf32>
    %359 = vector.shape_cast %356 : vector<8x128xf32> to vector<1x1x8x128xf32>
    tpu.vector_store %arg3[%c2_245, %c8_246, %c0_247, %c0_248], %359 {strides = array<i32>} : memref<4x10x8x128xf32, #tpu.memory_space<vmem>>, vector<1x1x8x128xf32>,
    %c2_249 = arith.constant 2 : index
    %c9_250 = arith.constant 9 : index
    %360 = memref.load %arg2[%c2_249, %c9_250] : memref<4x10xf32, #tpu.memory_space<smem>>
    %361 = vector.broadcast %360 : f32 to vector<8x128xf32>
    %362 = arith.subf %69, %361 : vector<8x128xf32>
    %cst_251 = arith.constant 0.000000e+00 : f32
    %363 = vector.broadcast %cst_251 : f32 to vector<8x128xf32>
    %364 = arith.cmpf ogt, %362, %363 : vector<8x128xf32>
    %365 = arith.extui %364 : vector<8x128xi1> to vector<8x128xi32>
    %366 = arith.sitofp %365 : vector<8x128xi32> to vector<8x128xf32>
    %c2_252 = arith.constant 2 : index
    %c9_253 = arith.constant 9 : index
    %c0_254 = arith.constant 0 : index
    %c0_255 = arith.constant 0 : index
    %367 = vector.load %arg3[%c2_252, %c9_253, %c0_254, %c0_255] : memref<4x10x8x128xf32, #tpu.memory_space<vmem>>, vector<1x1x8x128xf32>
    %368 = vector.shape_cast %367 : vector<1x1x8x128xf32> to vector<8x128xf32>
    %369 = vector.shape_cast %366 : vector<8x128xf32> to vector<1x1x8x128xf32>
    tpu.vector_store %arg3[%c2_252, %c9_253, %c0_254, %c0_255], %369 {strides = array<i32>} : memref<4x10x8x128xf32, #tpu.memory_space<vmem>>, vector<1x1x8x128xf32>,
    %c3_256 = arith.constant 3 : index
    %c0_257 = arith.constant 0 : index
    %370 = memref.load %arg2[%c3_256, %c0_257] : memref<4x10xf32, #tpu.memory_space<smem>>
    %371 = vector.broadcast %370 : f32 to vector<8x128xf32>
    %372 = arith.subf %67, %371 : vector<8x128xf32>
    %cst_258 = arith.constant 0.000000e+00 : f32
    %373 = vector.broadcast %cst_258 : f32 to vector<8x128xf32>
    %374 = arith.cmpf ogt, %372, %373 : vector<8x128xf32>
    %375 = arith.extui %374 : vector<8x128xi1> to vector<8x128xi32>
    %376 = arith.sitofp %375 : vector<8x128xi32> to vector<8x128xf32>
    %c3_259 = arith.constant 3 : index
    %c0_260 = arith.constant 0 : index
    %c0_261 = arith.constant 0 : index
    %c0_262 = arith.constant 0 : index
    %377 = vector.load %arg3[%c3_259, %c0_260, %c0_261, %c0_262] : memref<4x10x8x128xf32, #tpu.memory_space<vmem>>, vector<1x1x8x128xf32>
    %378 = vector.shape_cast %377 : vector<1x1x8x128xf32> to vector<8x128xf32>
    %379 = vector.shape_cast %376 : vector<8x128xf32> to vector<1x1x8x128xf32>
    tpu.vector_store %arg3[%c3_259, %c0_260, %c0_261, %c0_262], %379 {strides = array<i32>} : memref<4x10x8x128xf32, #tpu.memory_space<vmem>>, vector<1x1x8x128xf32>,
    %c3_263 = arith.constant 3 : index
    %c1_264 = arith.constant 1 : index
    %380 = memref.load %arg2[%c3_263, %c1_264] : memref<4x10xf32, #tpu.memory_space<smem>>
    %381 = vector.broadcast %380 : f32 to vector<8x128xf32>
    %382 = arith.subf %67, %381 : vector<8x128xf32>
    %cst_265 = arith.constant 0.000000e+00 : f32
    %383 = vector.broadcast %cst_265 : f32 to vector<8x128xf32>
    %384 = arith.cmpf ogt, %382, %383 : vector<8x128xf32>
    %385 = arith.extui %384 : vector<8x128xi1> to vector<8x128xi32>
    %386 = arith.sitofp %385 : vector<8x128xi32> to vector<8x128xf32>
    %c3_266 = arith.constant 3 : index
    %c1_267 = arith.constant 1 : index
    %c0_268 = arith.constant 0 : index
    %c0_269 = arith.constant 0 : index
    %387 = vector.load %arg3[%c3_266, %c1_267, %c0_268, %c0_269] : memref<4x10x8x128xf32, #tpu.memory_space<vmem>>, vector<1x1x8x128xf32>
    %388 = vector.shape_cast %387 : vector<1x1x8x128xf32> to vector<8x128xf32>
    %389 = vector.shape_cast %386 : vector<8x128xf32> to vector<1x1x8x128xf32>
    tpu.vector_store %arg3[%c3_266, %c1_267, %c0_268, %c0_269], %389 {strides = array<i32>} : memref<4x10x8x128xf32, #tpu.memory_space<vmem>>, vector<1x1x8x128xf32>,
    %c3_270 = arith.constant 3 : index
    %c2_271 = arith.constant 2 : index
    %390 = memref.load %arg2[%c3_270, %c2_271] : memref<4x10xf32, #tpu.memory_space<smem>>
    %391 = vector.broadcast %390 : f32 to vector<8x128xf32>
    %392 = arith.subf %67, %391 : vector<8x128xf32>
    %cst_272 = arith.constant 0.000000e+00 : f32
    %393 = vector.broadcast %cst_272 : f32 to vector<8x128xf32>
    %394 = arith.cmpf ogt, %392, %393 : vector<8x128xf32>
    %395 = arith.extui %394 : vector<8x128xi1> to vector<8x128xi32>
    %396 = arith.sitofp %395 : vector<8x128xi32> to vector<8x128xf32>
    %c3_273 = arith.constant 3 : index
    %c2_274 = arith.constant 2 : index
    %c0_275 = arith.constant 0 : index
    %c0_276 = arith.constant 0 : index
    %397 = vector.load %arg3[%c3_273, %c2_274, %c0_275, %c0_276] : memref<4x10x8x128xf32, #tpu.memory_space<vmem>>, vector<1x1x8x128xf32>
    %398 = vector.shape_cast %397 : vector<1x1x8x128xf32> to vector<8x128xf32>
    %399 = vector.shape_cast %396 : vector<8x128xf32> to vector<1x1x8x128xf32>
    tpu.vector_store %arg3[%c3_273, %c2_274, %c0_275, %c0_276], %399 {strides = array<i32>} : memref<4x10x8x128xf32, #tpu.memory_space<vmem>>, vector<1x1x8x128xf32>,
    %c3_277 = arith.constant 3 : index
    %c3_278 = arith.constant 3 : index
    %400 = memref.load %arg2[%c3_277, %c3_278] : memref<4x10xf32, #tpu.memory_space<smem>>
    %401 = vector.broadcast %400 : f32 to vector<8x128xf32>
    %402 = arith.subf %67, %401 : vector<8x128xf32>
    %cst_279 = arith.constant 0.000000e+00 : f32
    %403 = vector.broadcast %cst_279 : f32 to vector<8x128xf32>
    %404 = arith.cmpf ogt, %402, %403 : vector<8x128xf32>
    %405 = arith.extui %404 : vector<8x128xi1> to vector<8x128xi32>
    %406 = arith.sitofp %405 : vector<8x128xi32> to vector<8x128xf32>
    %c3_280 = arith.constant 3 : index
    %c3_281 = arith.constant 3 : index
    %c0_282 = arith.constant 0 : index
    %c0_283 = arith.constant 0 : index
    %407 = vector.load %arg3[%c3_280, %c3_281, %c0_282, %c0_283] : memref<4x10x8x128xf32, #tpu.memory_space<vmem>>, vector<1x1x8x128xf32>
    %408 = vector.shape_cast %407 : vector<1x1x8x128xf32> to vector<8x128xf32>
    %409 = vector.shape_cast %406 : vector<8x128xf32> to vector<1x1x8x128xf32>
    tpu.vector_store %arg3[%c3_280, %c3_281, %c0_282, %c0_283], %409 {strides = array<i32>} : memref<4x10x8x128xf32, #tpu.memory_space<vmem>>, vector<1x1x8x128xf32>,
    %c3_284 = arith.constant 3 : index
    %c4_285 = arith.constant 4 : index
    %410 = memref.load %arg2[%c3_284, %c4_285] : memref<4x10xf32, #tpu.memory_space<smem>>
    %411 = vector.broadcast %410 : f32 to vector<8x128xf32>
    %412 = arith.subf %67, %411 : vector<8x128xf32>
    %cst_286 = arith.constant 0.000000e+00 : f32
    %413 = vector.broadcast %cst_286 : f32 to vector<8x128xf32>
    %414 = arith.cmpf ogt, %412, %413 : vector<8x128xf32>
    %415 = arith.extui %414 : vector<8x128xi1> to vector<8x128xi32>
    %416 = arith.sitofp %415 : vector<8x128xi32> to vector<8x128xf32>
    %c3_287 = arith.constant 3 : index
    %c4_288 = arith.constant 4 : index
    %c0_289 = arith.constant 0 : index
    %c0_290 = arith.constant 0 : index
    %417 = vector.load %arg3[%c3_287, %c4_288, %c0_289, %c0_290] : memref<4x10x8x128xf32, #tpu.memory_space<vmem>>, vector<1x1x8x128xf32>
    %418 = vector.shape_cast %417 : vector<1x1x8x128xf32> to vector<8x128xf32>
    %419 = vector.shape_cast %416 : vector<8x128xf32> to vector<1x1x8x128xf32>
    tpu.vector_store %arg3[%c3_287, %c4_288, %c0_289, %c0_290], %419 {strides = array<i32>} : memref<4x10x8x128xf32, #tpu.memory_space<vmem>>, vector<1x1x8x128xf32>,
    %c3_291 = arith.constant 3 : index
    %c5_292 = arith.constant 5 : index
    %420 = memref.load %arg2[%c3_291, %c5_292] : memref<4x10xf32, #tpu.memory_space<smem>>
    %421 = vector.broadcast %420 : f32 to vector<8x128xf32>
    %422 = arith.subf %67, %421 : vector<8x128xf32>
    %cst_293 = arith.constant 0.000000e+00 : f32
    %423 = vector.broadcast %cst_293 : f32 to vector<8x128xf32>
    %424 = arith.cmpf ogt, %422, %423 : vector<8x128xf32>
    %425 = arith.extui %424 : vector<8x128xi1> to vector<8x128xi32>
    %426 = arith.sitofp %425 : vector<8x128xi32> to vector<8x128xf32>
    %c3_294 = arith.constant 3 : index
    %c5_295 = arith.constant 5 : index
    %c0_296 = arith.constant 0 : index
    %c0_297 = arith.constant 0 : index
    %427 = vector.load %arg3[%c3_294, %c5_295, %c0_296, %c0_297] : memref<4x10x8x128xf32, #tpu.memory_space<vmem>>, vector<1x1x8x128xf32>
    %428 = vector.shape_cast %427 : vector<1x1x8x128xf32> to vector<8x128xf32>
    %429 = vector.shape_cast %426 : vector<8x128xf32> to vector<1x1x8x128xf32>
    tpu.vector_store %arg3[%c3_294, %c5_295, %c0_296, %c0_297], %429 {strides = array<i32>} : memref<4x10x8x128xf32, #tpu.memory_space<vmem>>, vector<1x1x8x128xf32>,
    %c3_298 = arith.constant 3 : index
    %c6_299 = arith.constant 6 : index
    %430 = memref.load %arg2[%c3_298, %c6_299] : memref<4x10xf32, #tpu.memory_space<smem>>
    %431 = vector.broadcast %430 : f32 to vector<8x128xf32>
    %432 = arith.subf %67, %431 : vector<8x128xf32>
    %cst_300 = arith.constant 0.000000e+00 : f32
    %433 = vector.broadcast %cst_300 : f32 to vector<8x128xf32>
    %434 = arith.cmpf ogt, %432, %433 : vector<8x128xf32>
    %435 = arith.extui %434 : vector<8x128xi1> to vector<8x128xi32>
    %436 = arith.sitofp %435 : vector<8x128xi32> to vector<8x128xf32>
    %c3_301 = arith.constant 3 : index
    %c6_302 = arith.constant 6 : index
    %c0_303 = arith.constant 0 : index
    %c0_304 = arith.constant 0 : index
    %437 = vector.load %arg3[%c3_301, %c6_302, %c0_303, %c0_304] : memref<4x10x8x128xf32, #tpu.memory_space<vmem>>, vector<1x1x8x128xf32>
    %438 = vector.shape_cast %437 : vector<1x1x8x128xf32> to vector<8x128xf32>
    %439 = vector.shape_cast %436 : vector<8x128xf32> to vector<1x1x8x128xf32>
    tpu.vector_store %arg3[%c3_301, %c6_302, %c0_303, %c0_304], %439 {strides = array<i32>} : memref<4x10x8x128xf32, #tpu.memory_space<vmem>>, vector<1x1x8x128xf32>,
    %c3_305 = arith.constant 3 : index
    %c7_306 = arith.constant 7 : index
    %440 = memref.load %arg2[%c3_305, %c7_306] : memref<4x10xf32, #tpu.memory_space<smem>>
    %441 = vector.broadcast %440 : f32 to vector<8x128xf32>
    %442 = arith.subf %67, %441 : vector<8x128xf32>
    %cst_307 = arith.constant 0.000000e+00 : f32
    %443 = vector.broadcast %cst_307 : f32 to vector<8x128xf32>
    %444 = arith.cmpf ogt, %442, %443 : vector<8x128xf32>
    %445 = arith.extui %444 : vector<8x128xi1> to vector<8x128xi32>
    %446 = arith.sitofp %445 : vector<8x128xi32> to vector<8x128xf32>
    %c3_308 = arith.constant 3 : index
    %c7_309 = arith.constant 7 : index
    %c0_310 = arith.constant 0 : index
    %c0_311 = arith.constant 0 : index
    %447 = vector.load %arg3[%c3_308, %c7_309, %c0_310, %c0_311] : memref<4x10x8x128xf32, #tpu.memory_space<vmem>>, vector<1x1x8x128xf32>
    %448 = vector.shape_cast %447 : vector<1x1x8x128xf32> to vector<8x128xf32>
    %449 = vector.shape_cast %446 : vector<8x128xf32> to vector<1x1x8x128xf32>
    tpu.vector_store %arg3[%c3_308, %c7_309, %c0_310, %c0_311], %449 {strides = array<i32>} : memref<4x10x8x128xf32, #tpu.memory_space<vmem>>, vector<1x1x8x128xf32>,
    %c3_312 = arith.constant 3 : index
    %c8_313 = arith.constant 8 : index
    %450 = memref.load %arg2[%c3_312, %c8_313] : memref<4x10xf32, #tpu.memory_space<smem>>
    %451 = vector.broadcast %450 : f32 to vector<8x128xf32>
    %452 = arith.subf %67, %451 : vector<8x128xf32>
    %cst_314 = arith.constant 0.000000e+00 : f32
    %453 = vector.broadcast %cst_314 : f32 to vector<8x128xf32>
    %454 = arith.cmpf ogt, %452, %453 : vector<8x128xf32>
    %455 = arith.extui %454 : vector<8x128xi1> to vector<8x128xi32>
    %456 = arith.sitofp %455 : vector<8x128xi32> to vector<8x128xf32>
    %c3_315 = arith.constant 3 : index
    %c8_316 = arith.constant 8 : index
    %c0_317 = arith.constant 0 : index
    %c0_318 = arith.constant 0 : index
    %457 = vector.load %arg3[%c3_315, %c8_316, %c0_317, %c0_318] : memref<4x10x8x128xf32, #tpu.memory_space<vmem>>, vector<1x1x8x128xf32>
    %458 = vector.shape_cast %457 : vector<1x1x8x128xf32> to vector<8x128xf32>
    %459 = vector.shape_cast %456 : vector<8x128xf32> to vector<1x1x8x128xf32>
    tpu.vector_store %arg3[%c3_315, %c8_316, %c0_317, %c0_318], %459 {strides = array<i32>} : memref<4x10x8x128xf32, #tpu.memory_space<vmem>>, vector<1x1x8x128xf32>,
    %c3_319 = arith.constant 3 : index
    %c9_320 = arith.constant 9 : index
    %460 = memref.load %arg2[%c3_319, %c9_320] : memref<4x10xf32, #tpu.memory_space<smem>>
    %461 = vector.broadcast %460 : f32 to vector<8x128xf32>
    %462 = arith.subf %67, %461 : vector<8x128xf32>
    %cst_321 = arith.constant 0.000000e+00 : f32
    %463 = vector.broadcast %cst_321 : f32 to vector<8x128xf32>
    %464 = arith.cmpf ogt, %462, %463 : vector<8x128xf32>
    %465 = arith.extui %464 : vector<8x128xi1> to vector<8x128xi32>
    %466 = arith.sitofp %465 : vector<8x128xi32> to vector<8x128xf32>
    %c3_322 = arith.constant 3 : index
    %c9_323 = arith.constant 9 : index
    %c0_324 = arith.constant 0 : index
    %c0_325 = arith.constant 0 : index
    %467 = vector.load %arg3[%c3_322, %c9_323, %c0_324, %c0_325] : memref<4x10x8x128xf32, #tpu.memory_space<vmem>>, vector<1x1x8x128xf32>
    %468 = vector.shape_cast %467 : vector<1x1x8x128xf32> to vector<8x128xf32>
    %469 = vector.shape_cast %466 : vector<8x128xf32> to vector<1x1x8x128xf32>
    tpu.vector_store %arg3[%c3_322, %c9_323, %c0_324, %c0_325], %469 {strides = array<i32>} : memref<4x10x8x128xf32, #tpu.memory_space<vmem>>, vector<1x1x8x128xf32>,
    return
  }
  func.func @transform_0(%arg0: i32) -> (i32, i32, i32) {
    %c0_i32 = arith.constant 0 : i32
    %c0_i32_0 = arith.constant 0 : i32
    %c0_i32_1 = arith.constant 0 : i32
    return %c0_i32, %c0_i32_0, %arg0 : i32, i32, i32
  }
  func.func @transform_1(%arg0: i32) -> (i32, i32) {
    %c0_i32 = arith.constant 0 : i32
    %c0_i32_0 = arith.constant 0 : i32
    %c0_i32_1 = arith.constant 0 : i32
    return %c0_i32, %c0_i32_0 : i32, i32
  }
  func.func @transform_2(%arg0: i32) -> (i32, i32, i32, i32) {
    %c0_i32 = arith.constant 0 : i32
    %c0_i32_0 = arith.constant 0 : i32
    %c0_i32_1 = arith.constant 0 : i32
    %c0_i32_2 = arith.constant 0 : i32
    return %c0_i32, %c0_i32_0, %c0_i32_1, %arg0 : i32, i32, i32, i32
  }
}

</mosaic_0001>

<bundles_post_ra>
// kernel: tpu_custom_call.1
= control target key start
LH: loop header
LB: loop body
LE: loop exit
PB: predicated region body
PF: predicated region fallthrough
CT: control target
= control target key end

     0   :  { %7 = vsyncpa [#allocation3], 0  ;;  %s848_s0 = inlined_call_operand.hbm [shape: f32[3,12,128], index: 0, kind: input, shape index: {}]   ;;  %s849_s1 = inlined_call_operand.hbm [shape: f32[4,10], index: 1, kind: input, shape index: {}]   ;;  %s850_s2 = inlined_call_operand.hbm [shape: f32[4,10,8,128], index: 2, kind: output, shape index: {}]  }
   0x1   :  { %8 = vsyncpa [#allocation5], 0 }
   0x2   :  { %9 = vsyncpa [#allocation4], 0  ;;  %s575_s9 = smov [#allocation2]  }
   0x3   :  { %s15_s10 = sshll.u32 %s575_s9, 4  ;;  %s16_s10 = int_to_ptr.vmem [resolvable:$true] %s15_s10 }
   0x4   :  { %s529_s11 = scalar_lea.vmem %s16_s10, 768  ;;  %p534_p1 = scmp.lt.s32.totalorder %s16_s10, %s16_s10 }
   0x5   :  { %p530_p0 = scmp.ne.s32.totalorder %s16_s10, %s529_s11  ;;  %p535_p2 = scmp.lt.s32.totalorder %s529_s11, %s529_s11 }
   0x7   :  { %p536_p3 = por %p535_p2, %p534_p1 }
   0x9   :  { %p537_p4 = pnand %p536_p3, %p530_p0 }
   0xb   :  { %540 = shalt.err (!%p537_p4)
}
   0xc   :  { %s576_s12 = smov 128   ;;  %s577_s13 = smov 8  }
   0xd   :  { %21 = dma.hbm_to_vmem [thread:$0]  %s848_s0, 768, %s16_s10, [#allocation3], %s576_s12, %s576_s12, %s577_s13  }
   0xe   :  { %s578_s16 = smov [#allocation6]  }
   0xf   :  { %29 = dma.hbm_to_smem %s849_s1, 64, %s578_s16, [#allocation5]  }
  0x10   :  { %569 = dma.done.wait [#allocation3], 768  }
  0x11   :  { %570 = vsyncadd [#allocation3], 4294966528 }
  0x12   :  { %571 = dma.done.wait [#allocation5], 64  }
  0x13   :  { %572 = vsyncadd [#allocation5], 4294967232 }
  0x14   :  { %36 = sfence }
  0x15   :  { %v605_v0 = vld [vmem:[#allocation2 + $0x22] sm:$0xff]  ;;  %s607_s19 = sld [smem:[#allocation6]]  ;;  %v53_v5 = vld [vmem:[#allocation2 + $0x10] sm:$0xff]  ;;  %v579_v60 = vmov 0.0  }
  0x16   :  { %v39_v1 = vld [vmem:[#allocation2] sm:$0xff]  ;;  %v55_v6 = vld [vmem:[#allocation2 + $0x12] sm:$0xff]  ;;  %v74_v7 = vmul.f32 2.0, %v605_v0  ;;  %s610_s0 = sld [smem:[#allocation6 + $0x1]] }
  0x17   :  { %v41_v2 = vld [vmem:[#allocation2 + $0x2] sm:$0xff]  ;;  %v57_v8 = vld [vmem:[#allocation2 + $0x14] sm:$0xff]  ;;  %v60_v9 = vmul.f32 2.0, %v55_v6  ;;  %s612_s1 = sld [smem:[#allocation6 + $0x2]] }
  0x18   :  { %v43_v3 = vld [vmem:[#allocation2 + $0x4] sm:$0xff]  ;;  %v46_v4 = vmul.f32 2.0, %v41_v2  ;;  %v54_v16 = vld [vmem:[#allocation2 + $0x11] sm:$0xff]  ;;  %s614_s20 = sld [smem:[#allocation6 + $0x3]] }
  0x19   :  { %v68_v10 = vld [vmem:[#allocation2 + $0x20] sm:$0xff]  ;;  %v61_v17 = vsub.f32 %v57_v8, %v60_v9  ;;  %v56_v19 = vld [vmem:[#allocation2 + $0x13] sm:$0xff]  ;;  %s616_s21 = sld [smem:[#allocation6 + $0x4]] }
  0x1a   :  { %v71_v11 = vld [vmem:[#allocation2 + $0x24] sm:$0xff]  ;;  %v47_v12 = vsub.f32 %v43_v3, %v46_v4  ;;  %v58_v22 = vsub.f32 %v56_v19, %v54_v16  ;;  %s618_s22 = sld [smem:[#allocation6 + $0x5]] }
  0x1b   :  { %v75_v13 = vsub.f32 %v71_v11, %v74_v7  ;;  %v40_v14 = vld [vmem:[#allocation2 + $0x1] sm:$0xff]  ;;  %v62_v25 = vadd.f32 %v61_v17, %v53_v5  ;;  %s620_s23 = sld [smem:[#allocation6 + $0x6]]  ;;  %v96_v41 = vstv %s607_s19 }
  0x1c   :  { %v42_v15 = vld [vmem:[#allocation2 + $0x3] sm:$0xff]  ;;  %v48_v20 = vadd.f32 %v47_v12, %v39_v1  ;;  %v59_v29 = vmul.f32 0.5, %v58_v22  ;;  %s622_s24 = sld [smem:[#allocation6 + $0x7]]  ;;  %v103_v42 = vstv %s610_s0 }
  0x1d   :  { %v44_v18 = vsub.f32 %v42_v15, %v40_v14  ;;  %v76_v21 = vadd.f32 %v75_v13, %v68_v10  ;;  %v69_v23 = vld [vmem:[#allocation2 + $0x21] sm:$0xff]  ;;  %v63_v30 = vmul.f32 0.25, %v62_v25  ;;  %s624_s25 = sld [smem:[#allocation6 + $0x8]]  ;;  %v111_v43 = vstv %s612_s1 }
  0x1e   :  { %v70_v24 = vld [vmem:[#allocation2 + $0x23] sm:$0xff]  ;;  %v49_v27 = vmul.f32 0.25, %v48_v20  ;;  %v66_v34 = vmul.f32 %v59_v29, %v59_v29  ;;  %s626_s26 = sld [smem:[#allocation6 + $0x9]]  ;;  %v119_v44 = vstv %s614_s20 }
  0x1f   :  { %v45_v26 = vmul.f32 0.5, %v44_v18  ;;  %v77_v28 = vmul.f32 0.25, %v76_v21  ;;  %v72_v32 = vsub.f32 %v70_v24, %v69_v23  ;;  %v64_v35 = vmul.f32 %v63_v30, %v63_v30  ;;  %s451_s27 = sld [smem:[#allocation6 + $0x80]] }
  0x20   :  { %v50_v33 = vmul.f32 %v49_v27, %v49_v27  ;;  %s453_s28 = sld [smem:[#allocation6 + $0x81]]  ;;  %v127_v46 = vstv %s616_s21  ;;  %v135_v47 = vstv %s618_s22 }
  0x21   :  { %v51_v31 = vmul.f32 %v45_v26, %v45_v26  ;;  %v78_v36 = vmul.f32 %v77_v28, %v77_v28  ;;  %v73_v39 = vmul.f32 0.5, %v72_v32  ;;  %s455_s29 = sld [smem:[#allocation6 + $0x82]]  ;;  %v143_v48 = vstv %s620_s23 }
  0x22   :  { %v65_v38 = vadd.f32 %v64_v35, %v50_v33  ;;  %s633_s30 = sld [smem:[#allocation6 + $0x83]]  ;;  %v151_v50 = vstv %s622_s24 }
  0x23   :  { %v628_v37 = vadd.f32 %v66_v34, %v51_v31  ;;  %s637_s3 = sld [smem:[#allocation6 + $0x84]]  ;;  %v644_v45 = vand.u32 2147483647, %v73_v39  ;;  %v159_v53 = vstv %s624_s25 }
  0x24   :  { %v631_v40 = vadd.f32 %v78_v36, %v65_v38  ;;  %s642_s4 = sld [smem:[#allocation6 + $0x85]]  ;;  %v167_v30 = vstv %s626_s26 }
  0x25   :  { %517 = vrsqrt.f32 %v628_v37  ;;  %v175_v49 = vstv %s451_s27  ;;  %s649_s5 = sld [smem:[#allocation6 + $0x86]]  ;;  %vm90_vm0 = vcmp.eq.f32.partialorder %v628_v37, inf  ;;  %vm92_vm1 = vcmp.eq.f32.partialorder %v628_v37, 0.0 }
  0x26   :  { %519 = vrsqrt.f32 %v631_v40  ;;  %v176_v51 = vsub.f32 %v605_v0, %v175_v49  ;;  %v183_v52 = vstv %s453_s28  ;;  %s653_s6 = sld [smem:[#allocation6 + $0x87]]  ;;  %v93_v56 = vand.u32 2147483648, %v628_v37 }
  0x27   :  { %v184_v54 = vsub.f32 %v605_v0, %v183_v52  ;;  %v191_v55 = vstv %s455_s29  ;;  %s658_s7 = sld [smem:[#allocation6 + $0x88]]  ;;  %v86_v57 = vand.u32 2147483648, %v631_v40  ;;  %vm83_vm3 = vcmp.eq.f32.partialorder %v631_v40, inf  ;;  %s580_s29 = smov [#allocation7]  }
  0x28   :  { %vm177_vm2 = vcmp.gt.f32.partialorder %v176_v51, 0.0  ;;  %v192_v58 = vsub.f32 %v605_v0, %v191_v55  ;;  %v199_v59 = vstv %s633_s30  ;;  %s665_s8 = sld [smem:[#allocation6 + $0x89]]  ;;  %vm85_vm5 = vcmp.eq.f32.partialorder %v631_v40, 0.0  ;;  %s419_s30 = sshll.u32 %s580_s29, 4  ;;  %s420_s30 = int_to_ptr.vmem [resolvable:$true] %s419_s30 }
  0x29   :  { %v452_v61 = vsel %vm177_vm2, 1.0, %v579_v60  ;;  %vm185_vm4 = vcmp.gt.f32.partialorder %v184_v54, 0.0  ;;  %v200_v62 = vsub.f32 %v605_v0, %v199_v59  ;;  %v207_v63 = vstv %s637_s3  ;;  %s671_s9 = sld [smem:[#allocation6 + $0x100]]  ;;  %s549_s3 = scalar_lea.vmem %s420_s30, 5120 }
  0x2a   :  { %181 = vst [vmem:[#allocation7 + $0x50] sm:$0xff] %v452_v61  ;;  %v454_v1 = vsel %vm185_vm4, 1.0, %v579_v60  ;;  %vm193_vm6 = vcmp.gt.f32.partialorder %v192_v58, 0.0  ;;  %v208_v2 = vsub.f32 %v605_v0, %v207_v63  ;;  %v215_v3 = vstv %s642_s4  ;;  %s677_s10 = sld [smem:[#allocation6 + $0x101]]  ;;  %p550_p5 = scmp.ne.s32.totalorder %s420_s30, %s549_s3 }
  0x2b   :  { %189 = vst [vmem:[#allocation7 + $0x58] sm:$0xff] %v454_v1  ;;  %v456_v4 = vsel %vm193_vm6, 1.0, %v579_v60  ;;  %vm201_vm7 = vcmp.gt.f32.partialorder %v200_v62, 0.0  ;;  %v216_v5 = vsub.f32 %v605_v0, %v215_v3  ;;  %v223_v6 = vstv %s649_s5  ;;  %s682_s11 = sld [smem:[#allocation6 + $0x102]]  ;;  %p554_p6 = scmp.lt.s32.totalorder %s420_s30, %s420_s30 }
  0x2c   :  { %197 = vst [vmem:[#allocation7 + $0x60] sm:$0xff] %v456_v4  ;;  %v458_v7 = vsel %vm201_vm7, 1.0, %v579_v60  ;;  %vm209_vm8 = vcmp.gt.f32.partialorder %v208_v2, 0.0  ;;  %v224_v8 = vsub.f32 %v605_v0, %v223_v6  ;;  %v231_v9 = vstv %s653_s6  ;;  %s687_s14 = sld [smem:[#allocation6 + $0x103]]  ;;  %p555_p7 = scmp.lt.s32.totalorder %s549_s3, %s549_s3 }
  0x2d   :  { %205 = vst [vmem:[#allocation7 + $0x68] sm:$0xff] %v458_v7  ;;  %v460_v10 = vsel %vm209_vm8, 1.0, %v579_v60  ;;  %vm217_vm9 = vcmp.gt.f32.partialorder %v216_v5, 0.0  ;;  %v232_v11 = vsub.f32 %v605_v0, %v231_v9  ;;  %v239_v12 = vstv %s658_s7  ;;  %s692_s15 = sld [smem:[#allocation6 + $0x104]] }
  0x2e   :  { %213 = vst [vmem:[#allocation7 + $0x70] sm:$0xff] %v460_v10  ;;  %v462_v14 = vsel %vm217_vm9, 1.0, %v579_v60  ;;  %vm225_vm10 = vcmp.gt.f32.partialorder %v224_v8, 0.0  ;;  %v240_v15 = vsub.f32 %v605_v0, %v239_v12  ;;  %v247_v16 = vstv %s665_s8  ;;  %s697_s16 = sld [smem:[#allocation6 + $0x105]]  ;;  %p556_p8 = por %p555_p7, %p554_p6 }
  0x2f   :  { %221 = vst [vmem:[#allocation7 + $0x78] sm:$0xff] %v462_v14  ;;  %v464_v17 = vsel %vm225_vm10, 1.0, %v579_v60  ;;  %vm233_vm11 = vcmp.gt.f32.partialorder %v232_v11, 0.0  ;;  %v248_v18 = vsub.f32 %v605_v0, %v247_v16  ;;  %v255_v21 = vstv %s671_s9  ;;  %s733_s17 = sld [smem:[#allocation6 + $0x106]] }
  0x30   :  { %229 = vst [vmem:[#allocation7 + $0x80] sm:$0xff] %v464_v17  ;;  %v466_v20 = vsel %vm233_vm11, 1.0, %v579_v60  ;;  %vm241_vm12 = vcmp.gt.f32.partialorder %v240_v15, 0.0  ;;  %v263_v22 = vstv %s677_s10  ;;  %s743_s18 = sld [smem:[#allocation6 + $0x107]]  ;;  %p557_p9 = pnand %p556_p8, %p550_p5 }
  0x31   :  { %237 = vst [vmem:[#allocation7 + $0x88] sm:$0xff] %v466_v20  ;;  %v468_v24 = vsel %vm241_vm12, 1.0, %v579_v60  ;;  %vm249_vm13 = vcmp.gt.f32.partialorder %v248_v18, 0.0  ;;  %v271_v25 = vstv %s682_s11  ;;  %s753_s26 = sld [smem:[#allocation6 + $0x108]] }
  0x32   :  { %v518_v13 = vpop.eup %517  ;;  %245 = vst [vmem:[#allocation7 + $0x90] sm:$0xff] %v468_v24  ;;  %v470_v27 = vsel %vm249_vm13, 1.0, %v579_v60  ;;  %v279_v29 = vstv %s687_s14  ;;  %s755_s19 = sld [smem:[#allocation6 + $0x109]] }
  0x33   :  { %v89_v19 = vmul.f32 %v518_v13, %v628_v37  ;;  %v520_v23 = vpop.eup %519  ;;  %253 = vst [vmem:[#allocation7 + $0x98] sm:$0xff] %v470_v27  ;;  %v287_v36 = vstv %s692_s15  ;;  %s761_s0 = sld [smem:[#allocation6 + $0x180]] }
  0x34   :  { %v82_v26 = vmul.f32 %v520_v23, %v631_v40  ;;  %s763_s1 = sld [smem:[#allocation6 + $0x181]] }
  0x35   :  { %v91_v0 = vsel %vm90_vm0, %v628_v37, %v89_v19  ;;  %v295_v37 = vstv %s697_s16  ;;  %s769_s20 = sld [smem:[#allocation6 + $0x182]]  ;;  %v303_v2 = vstv %s733_s17 }
  0x36   :  { %v716_v28 = vsel %vm92_vm1, %v93_v56, %v91_v0  ;;  %v84_v34 = vsel %vm83_vm3, %v631_v40, %v82_v26  ;;  %s777_s21 = sld [smem:[#allocation6 + $0x183]]  ;;  %v311_v8 = vstv %s743_s18 }
  0x37   :  { %v256_v31 = vsub.f32 %v716_v28, %v255_v21  ;;  %v264_v32 = vsub.f32 %v716_v28, %v263_v22  ;;  %v272_v33 = vsub.f32 %v716_v28, %v271_v25  ;;  %v280_v35 = vsub.f32 %v716_v28, %v279_v29  ;;  %s783_s22 = sld [smem:[#allocation6 + $0x184]] }
  0x38   :  { %v87_v38 = vsel %vm85_vm5, %v86_v57, %v84_v34  ;;  %v288_v63 = vsub.f32 %v716_v28, %v287_v36  ;;  %s787_s23 = sld [smem:[#allocation6 + $0x185]]  ;;  %v304_v7 = vsub.f32 %v716_v28, %v303_v2  ;;  %v312_v9 = vsub.f32 %v716_v28, %v311_v8 }
  0x39   :  { %vm257_vm14 = vcmp.gt.f32.partialorder %v256_v31, 0.0  ;;  %vm265_vm15 = vcmp.gt.f32.partialorder %v264_v32, 0.0  ;;  %vm273_vm0 = vcmp.gt.f32.partialorder %v272_v33, 0.0  ;;  %v97_v39 = vsub.f32 %v87_v38, %v96_v41  ;;  %s791_s24 = sld [smem:[#allocation6 + $0x186]] }
  0x3a   :  { %v104_v49 = vsub.f32 %v87_v38, %v103_v42  ;;  %v112_v51 = vsub.f32 %v87_v38, %v111_v43  ;;  %v120_v52 = vsub.f32 %v87_v38, %v119_v44  ;;  %v128_v54 = vsub.f32 %v87_v38, %v127_v46  ;;  %s797_s25 = sld [smem:[#allocation6 + $0x187]] }
  0x3b   :  { %v136_v40 = vsub.f32 %v87_v38, %v135_v47  ;;  %v144_v55 = vsub.f32 %v87_v38, %v143_v48  ;;  %v152_v56 = vsub.f32 %v87_v38, %v151_v50  ;;  %vm98_vm1 = vcmp.gt.f32.partialorder %v97_v39, 0.0  ;;  %s806_s27 = sld [smem:[#allocation6 + $0x188]] }
  0x3c   :  { %vm105_vm2 = vcmp.gt.f32.partialorder %v104_v49, 0.0  ;;  %vm113_vm3 = vcmp.gt.f32.partialorder %v112_v51, 0.0  ;;  %vm121_vm4 = vcmp.gt.f32.partialorder %v120_v52, 0.0  ;;  %v432_v41 = vsel %vm98_vm1, 1.0, %v579_v60  ;;  %s811_s28 = sld [smem:[#allocation6 + $0x189]] }
  0x3d   :  { %v434_v42 = vsel %vm105_vm2, 1.0, %v579_v60  ;;  %v436_v43 = vsel %vm113_vm3, 1.0, %v579_v60  ;;  %v438_v44 = vsel %vm121_vm4, 1.0, %v579_v60  ;;  %101 = vst [vmem:[#allocation7] sm:$0xff] %v432_v41  ;;  %vm129_vm5 = vcmp.gt.f32.partialorder %v128_v54, 0.0 }
  0x3e   :  { %109 = vst [vmem:[#allocation7 + $0x8] sm:$0xff] %v434_v42  ;;  %117 = vst [vmem:[#allocation7 + $0x10] sm:$0xff] %v436_v43  ;;  %vm137_vm6 = vcmp.gt.f32.partialorder %v136_v40, 0.0  ;;  %vm145_vm7 = vcmp.gt.f32.partialorder %v144_v55, 0.0  ;;  %vm153_vm8 = vcmp.gt.f32.partialorder %v152_v56, 0.0  ;;  %v440_v46 = vsel %vm129_vm5, 1.0, %v579_v60 }
  0x3f   :  { %125 = vst [vmem:[#allocation7 + $0x18] sm:$0xff] %v438_v44  ;;  %v442_v47 = vsel %vm137_vm6, 1.0, %v579_v60  ;;  %v444_v48 = vsel %vm145_vm7, 1.0, %v579_v60  ;;  %v446_v50 = vsel %vm153_vm8, 1.0, %v579_v60  ;;  %133 = vst [vmem:[#allocation7 + $0x20] sm:$0xff] %v440_v46  ;;  %v160_v57 = vsub.f32 %v87_v38, %v159_v53 }
  0x40   :  { %141 = vst [vmem:[#allocation7 + $0x28] sm:$0xff] %v442_v47  ;;  %149 = vst [vmem:[#allocation7 + $0x30] sm:$0xff] %v444_v48  ;;  %v168_v58 = vsub.f32 %v87_v38, %v167_v30  ;;  %v472_v59 = vsel %vm257_vm14, 1.0, %v579_v60  ;;  %v474_v61 = vsel %vm265_vm15, 1.0, %v579_v60  ;;  %v476_v62 = vsel %vm273_vm0, 1.0, %v579_v60 }
  0x41   :  { %157 = vst [vmem:[#allocation7 + $0x38] sm:$0xff] %v446_v50  ;;  %261 = vst [vmem:[#allocation7 + $0xa0] sm:$0xff] %v472_v59  ;;  %vm281_vm9 = vcmp.gt.f32.partialorder %v280_v35, 0.0  ;;  %v296_v53 = vsub.f32 %v716_v28, %v295_v37  ;;  %vm161_vm10 = vcmp.gt.f32.partialorder %v160_v57, 0.0  ;;  %vm289_vm12 = vcmp.gt.f32.partialorder %v288_v63, 0.0 }
  0x42   :  { %269 = vst [vmem:[#allocation7 + $0xa8] sm:$0xff] %v474_v61  ;;  %vm169_vm11 = vcmp.gt.f32.partialorder %v168_v58, 0.0  ;;  %277 = vst [vmem:[#allocation7 + $0xb0] sm:$0xff] %v476_v62  ;;  %v478_v1 = vsel %vm281_vm9, 1.0, %v579_v60  ;;  %v448_v3 = vsel %vm161_vm10, 1.0, %v579_v60  ;;  %v480_v5 = vsel %vm289_vm12, 1.0, %v579_v60 }
  0x43   :  { %v450_v4 = vsel %vm169_vm11, 1.0, %v579_v60  ;;  %285 = vst [vmem:[#allocation7 + $0xb8] sm:$0xff] %v478_v1  ;;  %vm297_vm13 = vcmp.gt.f32.partialorder %v296_v53, 0.0  ;;  %165 = vst [vmem:[#allocation7 + $0x40] sm:$0xff] %v448_v3  ;;  %v319_v10 = vstv %s753_s26  ;;  %v327_v11 = vstv %s755_s19 }
  0x44   :  { %173 = vst [vmem:[#allocation7 + $0x48] sm:$0xff] %v450_v4  ;;  %v482_v6 = vsel %vm297_vm13, 1.0, %v579_v60  ;;  %293 = vst [vmem:[#allocation7 + $0xc0] sm:$0xff] %v480_v5  ;;  %v335_v12 = vstv %s761_s0  ;;  %vm305_vm14 = vcmp.gt.f32.partialorder %v304_v7, 0.0  ;;  %v320_v13 = vsub.f32 %v716_v28, %v319_v10 }
  0x45   :  { %301 = vst [vmem:[#allocation7 + $0xc8] sm:$0xff] %v482_v6  ;;  %v328_v14 = vsub.f32 %v716_v28, %v327_v11  ;;  %v336_v15 = vsub.f32 %v644_v45, %v335_v12  ;;  %v484_v16 = vsel %vm305_vm14, 1.0, %v579_v60  ;;  %vm313_vm15 = vcmp.gt.f32.partialorder %v312_v9, 0.0 }
  0x46   :  { %v343_v17 = vstv %s763_s1  ;;  %v351_v18 = vstv %s769_s20  ;;  %309 = vst [vmem:[#allocation7 + $0xd0] sm:$0xff] %v484_v16  ;;  %v486_v19 = vsel %vm313_vm15, 1.0, %v579_v60  ;;  %vm321_vm0 = vcmp.gt.f32.partialorder %v320_v13, 0.0 }
  0x47   :  { %vm329_vm1 = vcmp.gt.f32.partialorder %v328_v14, 0.0  ;;  %vm337_vm2 = vcmp.gt.f32.partialorder %v336_v15, 0.0  ;;  %317 = vst [vmem:[#allocation7 + $0xd8] sm:$0xff] %v486_v19  ;;  %v488_v20 = vsel %vm321_vm0, 1.0, %v579_v60  ;;  %v344_v23 = vsub.f32 %v644_v45, %v343_v17 }
  0x48   :  { %v490_v21 = vsel %vm329_vm1, 1.0, %v579_v60  ;;  %v492_v22 = vsel %vm337_vm2, 1.0, %v579_v60  ;;  %325 = vst [vmem:[#allocation7 + $0xe0] sm:$0xff] %v488_v20  ;;  %v352_v24 = vsub.f32 %v644_v45, %v351_v18  ;;  %v359_v0 = vstv %s777_s21 }
  0x49   :  { %333 = vst [vmem:[#allocation7 + $0xe8] sm:$0xff] %v490_v21  ;;  %341 = vst [vmem:[#allocation7 + $0xf0] sm:$0xff] %v492_v22  ;;  %v367_v25 = vstv %s783_s22  ;;  %v375_v26 = vstv %s787_s23  ;;  %vm345_vm3 = vcmp.gt.f32.partialorder %v344_v23, 0.0  ;;  %v360_v27 = vsub.f32 %v644_v45, %v359_v0 }
  0x4a   :  { %v368_v28 = vsub.f32 %v644_v45, %v367_v25  ;;  %v376_v29 = vsub.f32 %v644_v45, %v375_v26  ;;  %v494_v30 = vsel %vm345_vm3, 1.0, %v579_v60  ;;  %vm353_vm4 = vcmp.gt.f32.partialorder %v352_v24, 0.0 }
  0x4b   :  { %v383_v31 = vstv %s791_s24  ;;  %v391_v32 = vstv %s797_s25  ;;  %349 = vst [vmem:[#allocation7 + $0xf8] sm:$0xff] %v494_v30  ;;  %v496_v33 = vsel %vm353_vm4, 1.0, %v579_v60  ;;  %vm361_vm5 = vcmp.gt.f32.partialorder %v360_v27, 0.0 }
  0x4c   :  { %vm369_vm6 = vcmp.gt.f32.partialorder %v368_v28, 0.0  ;;  %vm377_vm7 = vcmp.gt.f32.partialorder %v376_v29, 0.0  ;;  %357 = vst [vmem:[#allocation7 + $0x100] sm:$0xff] %v496_v33  ;;  %v498_v34 = vsel %vm361_vm5, 1.0, %v579_v60  ;;  %v384_v37 = vsub.f32 %v644_v45, %v383_v31 }
  0x4d   :  { %v500_v35 = vsel %vm369_vm6, 1.0, %v579_v60  ;;  %v502_v36 = vsel %vm377_vm7, 1.0, %v579_v60  ;;  %365 = vst [vmem:[#allocation7 + $0x108] sm:$0xff] %v498_v34  ;;  %v392_v38 = vsub.f32 %v644_v45, %v391_v32  ;;  %v399_v39 = vstv %s806_s27 }
  0x4e   :  { %373 = vst [vmem:[#allocation7 + $0x110] sm:$0xff] %v500_v35  ;;  %381 = vst [vmem:[#allocation7 + $0x118] sm:$0xff] %v502_v36  ;;  %v407_v49 = vstv %s811_s28  ;;  %vm385_vm8 = vcmp.gt.f32.partialorder %v384_v37, 0.0  ;;  %v400_v51 = vsub.f32 %v644_v45, %v399_v39 }
  0x4f   :  { %v408_v52 = vsub.f32 %v644_v45, %v407_v49  ;;  %v504_v54 = vsel %vm385_vm8, 1.0, %v579_v60  ;;  %vm393_vm9 = vcmp.gt.f32.partialorder %v392_v38, 0.0 }
  0x50   :  { %389 = vst [vmem:[#allocation7 + $0x120] sm:$0xff] %v504_v54  ;;  %v506_v40 = vsel %vm393_vm9, 1.0, %v579_v60  ;;  %vm401_vm10 = vcmp.gt.f32.partialorder %v400_v51, 0.0 }
  0x51   :  { %vm409_vm11 = vcmp.gt.f32.partialorder %v408_v52, 0.0  ;;  %397 = vst [vmem:[#allocation7 + $0x128] sm:$0xff] %v506_v40  ;;  %v508_v55 = vsel %vm401_vm10, 1.0, %v579_v60 }
  0x52   :  { %v510_v56 = vsel %vm409_vm11, 1.0, %v579_v60  ;;  %405 = vst [vmem:[#allocation7 + $0x130] sm:$0xff] %v508_v55 }
  0x53   :  { %413 = vst [vmem:[#allocation7 + $0x138] sm:$0xff] %v510_v56 }
  0x54   :  { %560 = shalt.err (!%p557_p9)
}
  0x55   :  { %425 = dma.vmem_to_hbm [thread:$0]  %s420_s30, 5120, %s850_s2, [#allocation4], %s576_s12, %s576_s12, %s577_s13  }
  0x56   :  { %573 = dma.done.wait [#allocation4], 5120  }
  0x57   :  { %574 = vsyncadd [#allocation4], 4294962176 }
  0x58   :  { %429 = vsyncpa [#allocation3], 1 }
  0x59   :  { %430 = vsyncpa [#allocation4], 1 }
  0x5a   :  { %431 = vsyncpa [#allocation5], 1 }

</bundles_post_ra>
